<compile_context>
chip_gen: v7x
topology: tpu7x:2x2x1
jax: 0.10.0
libtpu: 0.0.40
codegen_flags: <defaults>
</compile_context>

<pallas_src>
import jax
import jax.numpy as jnp
from jax.experimental import pallas as pl
from jax.experimental.pallas import tpu as pltpu


def conv1x1_bn_kernel(w_ref, x_ref, gamma_ref, beta_ref, o_ref):
    # w_ref:     (tile_co, C_in)   slice of the 1x1 conv weight
    # x_ref:     (C_in, M)         NCHW input flattened over (H, W) [and N]
    # gamma_ref: (tile_co, 1)      BN affine scale slice
    # beta_ref:  (tile_co, 1)      BN affine shift slice
    # o_ref:     (tile_co, M)
    w = w_ref[...]
    x = x_ref[...]

    # 1x1 convolution == channel-contraction matmul on the MXU, f32 accumulate.
    y = jnp.dot(w, x, preferred_element_type=jnp.float32)  # (tile_co, M)

    # BatchNorm2d (training mode): per-output-channel stats over the M
    # batch*spatial positions (axis=1). Biased variance, eps=1e-5.
    # Two-pass form for numerical robustness (no E[y^2]-mean^2 cancellation).
    m = y.shape[1]
    inv_m = 1.0 / m
    mean = jnp.sum(y, axis=1, keepdims=True) * inv_m        # (tile_co, 1)
    centered = y - mean                                      # (tile_co, M)
    var = jnp.sum(centered * centered, axis=1, keepdims=True) * inv_m
    inv_std = jax.lax.rsqrt(var + 1e-5)                      # (tile_co, 1)

    a = inv_std * gamma_ref[...]                             # (tile_co, 1)
    o_ref[...] = (centered * a + beta_ref[...]).astype(o_ref.dtype)


def conv1x1_bn(x_nchw, conv_weight, gamma, beta, *, tile_co=None):
    """x_nchw: (N, C_in, H, W); conv_weight: (C_out, C_in, 1, 1)."""
    N, C_in, H, W = x_nchw.shape
    C_out = conv_weight.shape[0]
    M = N * H * W

    # NCHW -> (C_in, M). Free reshape when N == 1 (the module's case).
    if N == 1:
        x2d = x_nchw.reshape(C_in, M)
    else:
        x2d = jnp.moveaxis(x_nchw, 1, 0).reshape(C_in, M)

    # (C_out, C_in, 1, 1) -> (C_out, C_in): free reshape, no transpose.
    w2d = conv_weight.reshape(C_out, C_in)
    gamma2d = gamma.reshape(C_out, 1)
    beta2d = beta.reshape(C_out, 1)

    # Pick a small C_out tiling: enough tiles to shard across v7x's 2 TCs and
    # to double-buffer W / output DMA, but few enough that the ~0.35 us/step
    # grid overhead stays negligible on single-TC chips. Tile rows must be a
    # multiple of 8 (sublane alignment).
    if tile_co is None:
        tile_co = C_out
        for n_tiles_cand in (4, 2):
            if C_out % n_tiles_cand == 0 and (C_out // n_tiles_cand) % 8 == 0:
                tile_co = C_out // n_tiles_cand
                break
    n_tiles = C_out // tile_co

    cost = pl.CostEstimate(
        flops=2 * C_out * C_in * M,
        transcendentals=C_out,
        bytes_accessed=4 * (C_out * C_in + C_in * M + C_out * M),
    )

    out2d = pl.pallas_call(
        conv1x1_bn_kernel,
        out_shape=jax.ShapeDtypeStruct((C_out, M), x2d.dtype),
        grid=(n_tiles,),
        in_specs=[
            pl.BlockSpec((tile_co, C_in), lambda i: (i, 0)),   # W: tiled over C_out
            pl.BlockSpec((C_in, M), lambda i: (0, 0)),         # X: fetched once
            pl.BlockSpec((tile_co, 1), lambda i: (i, 0)),      # gamma slice
            pl.BlockSpec((tile_co, 1), lambda i: (i, 0)),      # beta slice
        ],
        out_specs=pl.BlockSpec((tile_co, M), lambda i: (i, 0)),
        compiler_params=pltpu.CompilerParams(
            dimension_semantics=("parallel",)),
        cost_estimate=cost,
    )(w2d, x2d, gamma2d, beta2d)

    # (C_out, M) -> NCHW. Free reshape when N == 1.
    if N == 1:
        return out2d.reshape(1, C_out, H, W)
    return jnp.moveaxis(out2d.reshape(C_out, N, H, W), 1, 0)


def reference(x_nchw, conv_weight, gamma, beta):
    """Plain-JAX reference for sanity checking."""
    N, C_in, H, W = x_nchw.shape
    C_out = conv_weight.shape[0]
    x2d = jnp.transpose(x_nchw, (0, 2, 3, 1)).reshape(-1, C_in)
    w2d = jnp.transpose(conv_weight.reshape(C_out, C_in), (1, 0))
    y = x2d @ w2d
    mean = jnp.mean(y, axis=0, keepdims=True)
    var = jnp.mean((y - mean) ** 2, axis=0, keepdims=True)
    yhat = (y - mean) * jax.lax.rsqrt(var + 1e-5)
    out2d = yhat * gamma.reshape(1, -1) + beta.reshape(1, -1)
    return jnp.transpose(out2d.reshape(N, H, W, C_out), (0, 3, 1, 2))


if __name__ == "__main__":
    # Shapes implied by the module: input (1, 576, 14, 14), conv weight
    # (576, 576, 1, 1), BN affine params of size 576.
    key = jax.random.PRNGKey(0)
    kx, kw = jax.random.split(key)

    N, C, H, W = 1, 576, 14, 14
    x = jax.random.normal(kx, (N, C, H, W), dtype=jnp.float32)

    # Deterministic parameter init (Conv2d has bias=False; BN affine defaults
    # to weight=1, bias=0 as in PyTorch __init__).
    fan_in = C * 1 * 1
    bound = 1.0 / (fan_in ** 0.5)
    conv_weight = jax.random.uniform(
        kw, (C, C, 1, 1), dtype=jnp.float32, minval=-bound, maxval=bound
    )
    gamma = jnp.ones((C,), dtype=jnp.float32)
    beta = jnp.zeros((C,), dtype=jnp.float32)

    out = conv1x1_bn(x, conv_weight, gamma, beta)
    out = jax.block_until_ready(out)

    ref = jax.block_until_ready(reference(x, conv_weight, gamma, beta))
    assert out.shape == (N, C, H, W)
    assert jnp.allclose(out, ref, atol=1e-3, rtol=1e-3)

    print("KERNEL_OK")
</pallas_src>

<mosaic_0001>
module attributes {stable_mosaic.version = 11 : i64} {
  func.func @conv1x1_bn_kernel(%arg0: i32, %arg1: memref<144x576xf32, #tpu.memory_space<vmem>>, %arg2: memref<576x196xf32, #tpu.memory_space<vmem>>, %arg3: memref<144x1xf32, #tpu.memory_space<vmem>>, %arg4: memref<144x1xf32, #tpu.memory_space<vmem>>, %arg5: memref<144x196xf32, #tpu.memory_space<vmem>>) attributes {dimension_semantics = [#tpu.dimension_semantics<parallel>], iteration_bounds = array<i64: 4>, scalar_prefetch = 0 : i64, scratch_operands = 0 : i64, tpu.core_type = #tpu.core_type<tc>, window_params = [{transform_indices = @transform_0, window_bounds = array<i64: 144, 576>}, {pipeline_mode = #tpu.pipeline_mode<synchronous>, transform_indices = @transform_1, window_bounds = array<i64: 576, 196>}, {transform_indices = @transform_2, window_bounds = array<i64: 144, 1>}, {transform_indices = @transform_3, window_bounds = array<i64: 144, 1>}, {transform_indices = @transform_4, window_bounds = array<i64: 144, 196>}]} {
    %c0 = arith.constant 0 : index
    %c0_0 = arith.constant 0 : index
    %0 = vector.load %arg1[%c0, %c0_0] : memref<144x576xf32, #tpu.memory_space<vmem>>, vector<144x576xf32>
    %c0_1 = arith.constant 0 : index
    %c0_2 = arith.constant 0 : index
    %1 = vector.load %arg2[%c0_1, %c0_2] : memref<576x196xf32, #tpu.memory_space<vmem>>, vector<576x196xf32>
    %cst = arith.constant dense<0.000000e+00> : vector<144x196xf32>
    %2 = tpu.matmul %0, %1, %cst {dimension_numbers = #tpu.dot_dimension_numbers<[1], [0], [0], [1], [0, 0, 1, 1], [], []>} : vector<144x576xf32>, vector<576x196xf32>, vector<144x196xf32> -> vector<144x196xf32>
    %cst_3 = arith.constant dense<0.000000e+00> : vector<144xf32>
    %3 = vector.multi_reduction <add>, %2, %cst_3 [1] : vector<144x196xf32> to vector<144xf32>
    %4 = vector.shape_cast %3 : vector<144xf32> to vector<144x1xf32>
    %cst_4 = arith.constant 0.00510204071 : f32
    %5 = vector.broadcast %cst_4 : f32 to vector<144x1xf32>
    %6 = arith.mulf %4, %5 : vector<144x1xf32>
    %7 = vector.broadcast %6 : vector<144x1xf32> to vector<144x196xf32>
    %8 = arith.subf %2, %7 : vector<144x196xf32>
    %9 = arith.mulf %8, %8 : vector<144x196xf32>
    %cst_5 = arith.constant dense<0.000000e+00> : vector<144xf32>
    %10 = vector.multi_reduction <add>, %9, %cst_5 [1] : vector<144x196xf32> to vector<144xf32>
    %11 = vector.shape_cast %10 : vector<144xf32> to vector<144x1xf32>
    %cst_6 = arith.constant 0.00510204071 : f32
    %12 = vector.broadcast %cst_6 : f32 to vector<144x1xf32>
    %13 = arith.mulf %11, %12 : vector<144x1xf32>
    %cst_7 = arith.constant 9.99999974E-6 : f32
    %14 = vector.broadcast %cst_7 : f32 to vector<144x1xf32>
    %15 = arith.addf %13, %14 : vector<144x1xf32>
    %16 = math.rsqrt %15 : vector<144x1xf32>
    %c0_8 = arith.constant 0 : index
    %c0_9 = arith.constant 0 : index
    %17 = vector.load %arg3[%c0_8, %c0_9] : memref<144x1xf32, #tpu.memory_space<vmem>>, vector<144x1xf32>
    %18 = arith.mulf %16, %17 : vector<144x1xf32>
    %19 = vector.broadcast %18 : vector<144x1xf32> to vector<144x196xf32>
    %20 = arith.mulf %8, %19 : vector<144x196xf32>
    %c0_10 = arith.constant 0 : index
    %c0_11 = arith.constant 0 : index
    %21 = vector.load %arg4[%c0_10, %c0_11] : memref<144x1xf32, #tpu.memory_space<vmem>>, vector<144x1xf32>
    %22 = vector.broadcast %21 : vector<144x1xf32> to vector<144x196xf32>
    %23 = arith.addf %20, %22 : vector<144x196xf32>
    %c0_12 = arith.constant 0 : index
    %c0_13 = arith.constant 0 : index
    %24 = vector.load %arg5[%c0_12, %c0_13] : memref<144x196xf32, #tpu.memory_space<vmem>>, vector<144x196xf32>
    tpu.vector_store %arg5[%c0_12, %c0_13], %23 {strides = array<i32>} : memref<144x196xf32, #tpu.memory_space<vmem>>, vector<144x196xf32>,
    return
  }
  func.func @transform_0(%arg0: i32) -> (i32, i32) {
    %c0_i32 = arith.constant 0 : i32
    %c0_i32_0 = arith.constant 0 : i32
    return %arg0, %c0_i32 : i32, i32
  }
  func.func @transform_1(%arg0: i32) -> (i32, i32) {
    %c0_i32 = arith.constant 0 : i32
    %c0_i32_0 = arith.constant 0 : i32
    %c0_i32_1 = arith.constant 0 : i32
    return %c0_i32, %c0_i32_0 : i32, i32
  }
  func.func @transform_2(%arg0: i32) -> (i32, i32) {
    %c0_i32 = arith.constant 0 : i32
    %c0_i32_0 = arith.constant 0 : i32
    return %arg0, %c0_i32 : i32, i32
  }
  func.func @transform_3(%arg0: i32) -> (i32, i32) {
    %c0_i32 = arith.constant 0 : i32
    %c0_i32_0 = arith.constant 0 : i32
    return %arg0, %c0_i32 : i32, i32
  }
  func.func @transform_4(%arg0: i32) -> (i32, i32) {
    %c0_i32 = arith.constant 0 : i32
    %c0_i32_0 = arith.constant 0 : i32
    return %arg0, %c0_i32 : i32, i32
  }
}

</mosaic_0001>

<bundles_post_ra>
// kernel: tpu_custom_call.1
= control target key start
LH: loop header
LB: loop body
LE: loop exit
PB: predicated region body
PF: predicated region fallthrough
CT: control target
= control target key end

     0   :  { %s2134_s15 = smov 0   ;;  %s3362_s0 = inlined_call_operand.vmem [shape: f32[576,576], index: 0, kind: input, shape index: {}]   ;;  %s3363_s1 = inlined_call_operand.vmem [shape: f32[576,196], index: 1, kind: input, shape index: {}]   ;;  %s3364_s2 = inlined_call_operand.vmem [shape: f32[576,1], index: 2, kind: input, shape index: {}]   ;;  %s3365_s3 = inlined_call_operand.vmem [shape: f32[576,1], index: 3, kind: input, shape index: {}]   ;;  %s3366_s4 = inlined_call_operand.vmem [shape: f32[576,196], index: 4, kind: output, shape index: {}]  }
   0x1 LB: > { %s1771_s16 = sadd.s32 4294967295, %s2105_s15   ;;  %p1775_p0 = scmp.ge.s32.totalorder %s2105_s15, 1  ;;  %s2105_s15 = sphi %s2134_s15, %s14_s15  }
   0x2   : > { %p186_p1 = scmp.lt.s32.totalorder %s2105_s15, 5 }
   0x4   : > { %p187_p2 = pnand %p1775_p0, %p186_p1 }
   0x5   : > { %v341_v0 = vld [vmem:[%s3363_s1 + $0x8] sm:$0xff] (!%p187_p2)  ;;  %v343_v1 = vld [vmem:[%s3363_s1 + $0x18] sm:$0xff] (!%p187_p2)  ;;  %v340_v5 = vld [vmem:[%s3363_s1] sm:$0xff] (!%p187_p2)  ;;  %s2361_s17 = smul.u32 (!%p187_p2), 18, %s1771_s16  ;;  %vm484_vm0 = vcmask (!%p187_p2), 523264   ;;  %vm1058_vm1 = vcmask (!%p187_p2), 556032  }
   0x6   : > { %190 = sbr.rel (%p187_p2) target bundleno = 905 (0x389), region = 36  ;;  %v405_v2 = vld [vmem:[%s3363_s1 + $0x208] sm:$0xff] (!%p187_p2)  ;;  %v1802_v3 = vpack.c.bf16 (!%p187_p2), %v343_v1, %v341_v0  ;;  %v407_v4 = vld [vmem:[%s3363_s1 + $0x218] sm:$0xff] (!%p187_p2)  ;;  %v342_v6 = vld [vmem:[%s3363_s1 + $0x10] sm:$0xff] (!%p187_p2) }
   0x7   : > { %v2160_v7 = vpack.c.bf16 (!%p187_p2), %v407_v4, %v405_v2  ;;  %v1804_v8 = vpack.c.bf16 (!%p187_p2), %v342_v6, %v340_v5  ;;  %v404_v9 = vld [vmem:[%s3363_s1 + $0x200] sm:$0xff] (!%p187_p2)  ;;  %v406_v10 = vld [vmem:[%s3363_s1 + $0x210] sm:$0xff] (!%p187_p2)  ;;  %v345_v11 = vld [vmem:[%s3363_s1 + $0x28] sm:$0xff] (!%p187_p2)  ;;  %p225_p3 = scmp.lt.s32.totalorder (!%p187_p2), %s2361_s17, 71 }
   0x8   : > { %1803 = vmatprep.subr.bf16.mxu1 (!%p187_p2), %v1802_v3  ;;  %v2171_v12 = vpack.c.bf16 (!%p187_p2), %v406_v10, %v404_v9  ;;  %v347_v13 = vld [vmem:[%s3363_s1 + $0x38] sm:$0xff] (!%p187_p2)  ;;  %v409_v14 = vld [vmem:[%s3363_s1 + $0x228] sm:$0xff] (!%p187_p2)  ;;  %v344_v18 = vld [vmem:[%s3363_s1 + $0x20] sm:$0xff] (!%p187_p2) }
   0x9   : > { %v411_v15 = vld [vmem:[%s3363_s1 + $0x238] sm:$0xff] (!%p187_p2)  ;;  %1867 = vmatprep.subr.bf16.mxu0 (!%p187_p2), %v2160_v7  ;;  %1805 = vmatpush1.bf16.msra.mxu1 (!%p187_p2), %v1804_v8  ;;  %v1806_v16 = vpack.c.bf16 (!%p187_p2), %v347_v13, %v345_v11  ;;  %v346_v19 = vld [vmem:[%s3363_s1 + $0x30] sm:$0xff] (!%p187_p2)  ;;  %v408_v20 = vld [vmem:[%s3363_s1 + $0x220] sm:$0xff] (!%p187_p2) }
   0xa   : > { %v2183_v17 = vpack.c.bf16 (!%p187_p2), %v411_v15, %v409_v14  ;;  %1869 = vmatpush1.bf16.msra.mxu0 (!%p187_p2), %v2171_v12  ;;  %v1808_v21 = vpack.c.bf16 (!%p187_p2), %v346_v19, %v344_v18  ;;  %v410_v22 = vld [vmem:[%s3363_s1 + $0x230] sm:$0xff] (!%p187_p2)  ;;  %v349_v23 = vld [vmem:[%s3363_s1 + $0x48] sm:$0xff] (!%p187_p2)  ;;  %v351_v24 = vld [vmem:[%s3363_s1 + $0x58] sm:$0xff] (!%p187_p2) }
   0xb   : > { %1807 = vmatprep.subr.bf16.mxu1 (!%p187_p2), %v1806_v16  ;;  %v2205_v25 = vpack.c.bf16 (!%p187_p2), %v410_v22, %v408_v20  ;;  %v1810_v26 = vpack.c.bf16 (!%p187_p2), %v351_v24, %v349_v23  ;;  %v413_v27 = vld [vmem:[%s3363_s1 + $0x248] sm:$0xff] (!%p187_p2)  ;;  %v415_v28 = vld [vmem:[%s3363_s1 + $0x258] sm:$0xff] (!%p187_p2)  ;;  %v348_v29 = vld [vmem:[%s3363_s1 + $0x40] sm:$0xff] (!%p187_p2) }
   0xc   : > { %1871 = vmatprep.subr.bf16.mxu0 (!%p187_p2), %v2183_v17  ;;  %v2216_v30 = vpack.c.bf16 (!%p187_p2), %v415_v28, %v413_v27  ;;  %v350_v31 = vld [vmem:[%s3363_s1 + $0x50] sm:$0xff] (!%p187_p2)  ;;  %v412_v32 = vld [vmem:[%s3363_s1 + $0x240] sm:$0xff] (!%p187_p2)  ;;  %v353_v35 = vld [vmem:[%s3363_s1 + $0x68] sm:$0xff] (!%p187_p2) }
   0xd   : > { %v414_v33 = vld [vmem:[%s3363_s1 + $0x250] sm:$0xff]  ;;  %1809 = vmatpush1.bf16.msra.mxu1 %v1808_v21  ;;  %v1812_v34 = vpack.c.bf16 %v350_v31, %v348_v29  ;;  %v355_v36 = vld [vmem:[%s3363_s1 + $0x78] sm:$0xff]  ;;  %v417_v37 = vld [vmem:[%s3363_s1 + $0x268] sm:$0xff]  ;;  %s3368_s17 = smov (!%p225_p3, %s2361_s17), 71 }
   0xe   : > { %1873 = vmatpush1.bf16.msra.mxu0 %v2205_v25  ;;  %1811 = vmatprep.subr.bf16.mxu1 %v1810_v26  ;;  %v2237_v38 = vpack.c.bf16 %v414_v33, %v412_v32  ;;  %v1814_v39 = vpack.c.bf16 %v355_v36, %v353_v35  ;;  %v419_v40 = vld [vmem:[%s3363_s1 + $0x278] sm:$0xff]  ;;  %v352_v41 = vld [vmem:[%s3363_s1 + $0x60] sm:$0xff]  ;;  %v354_v42 = vld [vmem:[%s3363_s1 + $0x70] sm:$0xff]  ;;  %s2050_s18 = smul.u32 40, %s3368_s17  ;;  %s1801_s5 = sshll.u32 %s3368_s17, 4 }
   0xf   : > { %1875 = vmatprep.subr.bf16.mxu0 %v2216_v30  ;;  %v2249_v43 = vpack.c.bf16 %v419_v40, %v417_v37  ;;  %v416_v44 = vld [vmem:[%s3363_s1 + $0x260] sm:$0xff]  ;;  %v418_v45 = vld [vmem:[%s3363_s1 + $0x270] sm:$0xff]  ;;  %v357_v46 = vld [vmem:[%s3363_s1 + $0x88] sm:$0xff]  ;;  %v1816_v50 = vpack.c.bf16 %v354_v42, %v352_v41  ;;  %s3246_s8 = scalar_lea.vmem %s3366_s4, %s1801_s5 }
  0x10   : > { %v359_v47 = vld [vmem:[%s3363_s1 + $0x98] sm:$0xff]  ;;  %v421_v48 = vld [vmem:[%s3363_s1 + $0x288] sm:$0xff]  ;;  %v2270_v51 = vpack.c.bf16 %v418_v45, %v416_v44  ;;  %v356_v53 = vld [vmem:[%s3363_s1 + $0x80] sm:$0xff]  ;;  %s2493_s10 = scalar_lea.vmem %s3362_s0, %s2050_s18 }
  0x11   : > { %v423_v49 = vld [vmem:[%s3363_s1 + $0x298] sm:$0xff]  ;;  %1813 = vmatpush1.bf16.msra.mxu1 %v1812_v34  ;;  %v1818_v52 = vpack.c.bf16 %v359_v47, %v357_v46  ;;  %v358_v54 = vld [vmem:[%s3363_s1 + $0x90] sm:$0xff]  ;;  %v420_v55 = vld [vmem:[%s3363_s1 + $0x280] sm:$0xff] }
  0x12   : > { %1877 = vmatpush1.bf16.msra.mxu0 %v2237_v38  ;;  %1815 = vmatprep.subr.bf16.mxu1 %v1814_v39  ;;  %v2282_v56 = vpack.c.bf16 %v423_v49, %v421_v48  ;;  %v422_v57 = vld [vmem:[%s3363_s1 + $0x290] sm:$0xff]  ;;  %v361_v58 = vld [vmem:[%s3363_s1 + $0xa8] sm:$0xff]  ;;  %v363_v59 = vld [vmem:[%s3363_s1 + $0xb8] sm:$0xff]  ;;  %v1820_v62 = vpack.c.bf16 %v358_v54, %v356_v53 }
  0x13   : > { %1879 = vmatprep.subr.bf16.mxu0 %v2249_v43  ;;  %v425_v60 = vld [vmem:[%s3363_s1 + $0x2a8] sm:$0xff]  ;;  %v427_v61 = vld [vmem:[%s3363_s1 + $0x2b8] sm:$0xff]  ;;  %v2300_v63 = vpack.c.bf16 %v422_v57, %v420_v55  ;;  %v1822_v0 = vpack.c.bf16 %v363_v59, %v361_v58  ;;  %v360_v1 = vld [vmem:[%s3363_s1 + $0xa0] sm:$0xff] }
  0x14   : > { %v362_v2 = vld [vmem:[%s3363_s1 + $0xb0] sm:$0xff]  ;;  %v424_v3 = vld [vmem:[%s3363_s1 + $0x2a0] sm:$0xff]  ;;  %v2312_v4 = vpack.c.bf16 %v427_v61, %v425_v60  ;;  %v365_v6 = vld [vmem:[%s3363_s1 + $0xc8] sm:$0xff] }
  0x15   : > { %1817 = vmatpush1.bf16.msra.mxu1 %v1816_v50  ;;  %v426_v5 = vld [vmem:[%s3363_s1 + $0x2b0] sm:$0xff]  ;;  %v367_v8 = vld [vmem:[%s3363_s1 + $0xd8] sm:$0xff]  ;;  %v429_v9 = vld [vmem:[%s3363_s1 + $0x2c8] sm:$0xff]  ;;  %v1824_v11 = vpack.c.bf16 %v362_v2, %v360_v1 }
  0x16   : > { %1881 = vmatpush1.bf16.msra.mxu0 %v2270_v51  ;;  %1819 = vmatprep.subr.bf16.mxu1 %v1818_v52  ;;  %v431_v10 = vld [vmem:[%s3363_s1 + $0x2d8] sm:$0xff]  ;;  %v2330_v13 = vpack.c.bf16 %v426_v5, %v424_v3  ;;  %v1826_v14 = vpack.c.bf16 %v367_v8, %v365_v6  ;;  %v364_v15 = vld [vmem:[%s3363_s1 + $0xc0] sm:$0xff]  ;;  %v366_v16 = vld [vmem:[%s3363_s1 + $0xd0] sm:$0xff] }
  0x17   : > { %1883 = vmatprep.subr.bf16.mxu0 %v2282_v56  ;;  %v428_v18 = vld [vmem:[%s3363_s1 + $0x2c0] sm:$0xff]  ;;  %v2342_v19 = vpack.c.bf16 %v431_v10, %v429_v9  ;;  %v430_v20 = vld [vmem:[%s3363_s1 + $0x2d0] sm:$0xff]  ;;  %v369_v21 = vld [vmem:[%s3363_s1 + $0xe8] sm:$0xff]  ;;  %v1828_v26 = vpack.c.bf16 %v366_v16, %v364_v15 }
  0x18   : > { %v371_v22 = vld [vmem:[%s3363_s1 + $0xf8] sm:$0xff]  ;;  %v433_v23 = vld [vmem:[%s3363_s1 + $0x2e8] sm:$0xff]  ;;  %v2364_v27 = vpack.c.bf16 %v430_v20, %v428_v18  ;;  %v368_v29 = vld [vmem:[%s3363_s1 + $0xe0] sm:$0xff] }
  0x19   : > { %1821 = vmatpush1.bf16.msra.mxu1 %v1820_v62  ;;  %v435_v24 = vld [vmem:[%s3363_s1 + $0x2f8] sm:$0xff]  ;;  %v1830_v28 = vpack.c.bf16 %v371_v22, %v369_v21  ;;  %v370_v31 = vld [vmem:[%s3363_s1 + $0xf0] sm:$0xff]  ;;  %v432_v32 = vld [vmem:[%s3363_s1 + $0x2e0] sm:$0xff] }
  0x1a   : > { %1885 = vmatpush1.bf16.msra.mxu0 %v2300_v63  ;;  %1823 = vmatprep.subr.bf16.mxu1 %v1822_v0  ;;  %v2376_v33 = vpack.c.bf16 %v435_v24, %v433_v23  ;;  %v434_v34 = vld [vmem:[%s3363_s1 + $0x2f0] sm:$0xff]  ;;  %v373_v35 = vld [vmem:[%s3363_s1 + $0x108] sm:$0xff]  ;;  %v375_v36 = vld [vmem:[%s3363_s1 + $0x118] sm:$0xff]  ;;  %v1832_v40 = vpack.c.bf16 %v370_v31, %v368_v29 }
  0x1b   : > { %1887 = vmatprep.subr.bf16.mxu0 %v2312_v4  ;;  %v437_v37 = vld [vmem:[%s3363_s1 + $0x308] sm:$0xff]  ;;  %v439_v39 = vld [vmem:[%s3363_s1 + $0x318] sm:$0xff]  ;;  %v2395_v41 = vpack.c.bf16 %v434_v34, %v432_v32  ;;  %v1834_v42 = vpack.c.bf16 %v375_v36, %v373_v35  ;;  %v372_v44 = vld [vmem:[%s3363_s1 + $0x100] sm:$0xff] }
  0x1c   : > { %v374_v45 = vld [vmem:[%s3363_s1 + $0x110] sm:$0xff]  ;;  %v436_v46 = vld [vmem:[%s3363_s1 + $0x300] sm:$0xff]  ;;  %v2407_v47 = vpack.c.bf16 %v439_v39, %v437_v37  ;;  %v377_v49 = vld [vmem:[%s3363_s1 + $0x128] sm:$0xff] }
  0x1d   : > { %1825 = vmatpush1.bf16.msra.mxu1 %v1824_v11  ;;  %v438_v48 = vld [vmem:[%s3363_s1 + $0x310] sm:$0xff]  ;;  %v379_v50 = vld [vmem:[%s3363_s1 + $0x138] sm:$0xff]  ;;  %v441_v52 = vld [vmem:[%s3363_s1 + $0x328] sm:$0xff]  ;;  %v1836_v54 = vpack.c.bf16 %v374_v45, %v372_v44 }
  0x1e   : > { %1889 = vmatpush1.bf16.msra.mxu0 %v2330_v13  ;;  %1827 = vmatprep.subr.bf16.mxu1 %v1826_v14  ;;  %v443_v53 = vld [vmem:[%s3363_s1 + $0x338] sm:$0xff]  ;;  %v2430_v55 = vpack.c.bf16 %v438_v48, %v436_v46  ;;  %v1838_v57 = vpack.c.bf16 %v379_v50, %v377_v49  ;;  %v376_v58 = vld [vmem:[%s3363_s1 + $0x120] sm:$0xff]  ;;  %v378_v59 = vld [vmem:[%s3363_s1 + $0x130] sm:$0xff] }
  0x1f   : > { %1891 = vmatprep.subr.bf16.mxu0 %v2342_v19  ;;  %v440_v60 = vld [vmem:[%s3363_s1 + $0x320] sm:$0xff]  ;;  %v2442_v61 = vpack.c.bf16 %v443_v53, %v441_v52  ;;  %v442_v62 = vld [vmem:[%s3363_s1 + $0x330] sm:$0xff]  ;;  %v381_v0 = vld [vmem:[%s3363_s1 + $0x148] sm:$0xff]  ;;  %v1840_v5 = vpack.c.bf16 %v378_v59, %v376_v58 }
  0x20   : > { %v383_v1 = vld [vmem:[%s3363_s1 + $0x158] sm:$0xff]  ;;  %v445_v2 = vld [vmem:[%s3363_s1 + $0x348] sm:$0xff]  ;;  %v2461_v6 = vpack.c.bf16 %v442_v62, %v440_v60  ;;  %v380_v9 = vld [vmem:[%s3363_s1 + $0x140] sm:$0xff] }
  0x21   : > { %1829 = vmatpush1.bf16.msra.mxu1 %v1828_v26  ;;  %v447_v3 = vld [vmem:[%s3363_s1 + $0x358] sm:$0xff]  ;;  %v1842_v8 = vpack.c.bf16 %v383_v1, %v381_v0  ;;  %v382_v10 = vld [vmem:[%s3363_s1 + $0x150] sm:$0xff]  ;;  %v444_v11 = vld [vmem:[%s3363_s1 + $0x340] sm:$0xff] }
  0x22   : > { %1893 = vmatpush1.bf16.msra.mxu0 %v2364_v27  ;;  %1831 = vmatprep.subr.bf16.mxu1 %v1830_v28  ;;  %v2473_v14 = vpack.c.bf16 %v447_v3, %v445_v2  ;;  %v446_v15 = vld [vmem:[%s3363_s1 + $0x350] sm:$0xff]  ;;  %v385_v16 = vld [vmem:[%s3363_s1 + $0x168] sm:$0xff]  ;;  %v387_v18 = vld [vmem:[%s3363_s1 + $0x178] sm:$0xff]  ;;  %v1844_v22 = vpack.c.bf16 %v382_v10, %v380_v9 }
  0x23   : > { %1895 = vmatprep.subr.bf16.mxu0 %v2376_v33  ;;  %v449_v20 = vld [vmem:[%s3363_s1 + $0x368] sm:$0xff]  ;;  %v451_v21 = vld [vmem:[%s3363_s1 + $0x378] sm:$0xff]  ;;  %v384_v23 = vld [vmem:[%s3363_s1 + $0x160] sm:$0xff]  ;;  %v2499_v24 = vpack.c.bf16 %v446_v15, %v444_v11  ;;  %v1846_v26 = vpack.c.bf16 %v387_v18, %v385_v16 }
  0x24   : > { %v386_v28 = vld [vmem:[%s3363_s1 + $0x170] sm:$0xff]  ;;  %v448_v29 = vld [vmem:[%s3363_s1 + $0x360] sm:$0xff]  ;;  %v2511_v32 = vpack.c.bf16 %v451_v21, %v449_v20  ;;  %v389_v34 = vld [vmem:[%s3363_s1 + $0x188] sm:$0xff] }
  0x25   : > { %1833 = vmatpush1.bf16.msra.mxu1 %v1832_v40  ;;  %v450_v31 = vld [vmem:[%s3363_s1 + $0x370] sm:$0xff]  ;;  %v391_v35 = vld [vmem:[%s3363_s1 + $0x198] sm:$0xff]  ;;  %v251_v36 = vld [vmem:[%s2493_s10 + $0x8] sm:$0xff] }
  0x26   : > { %1897 = vmatpush1.bf16.msra.mxu0 %v2395_v41  ;;  %1835 = vmatprep.subr.bf16.mxu1 %v1834_v42  ;;  %v453_v37 = vld [vmem:[%s3363_s1 + $0x388] sm:$0xff]  ;;  %v455_v39 = vld [vmem:[%s3363_s1 + $0x398] sm:$0xff]  ;;  %v1848_v42 = vpack.c.bf16 %v386_v28, %v384_v23  ;;  %v2528_v44 = vpack.c.bf16 %v450_v31, %v448_v29  ;;  %v1850_v45 = vpack.c.bf16 %v391_v35, %v389_v34  ;;  %v388_v46 = vld [vmem:[%s3363_s1 + $0x180] sm:$0xff] }
  0x27   : > { %1899 = vmatprep.subr.bf16.mxu0 %v2407_v47  ;;  %603 = vmatprep.mubr.f32.mxu1 %v251_v36  ;;  %v253_v40 = vld [vmem:[%s2493_s10 + $0x18] sm:$0xff]  ;;  %v390_v48 = vld [vmem:[%s3363_s1 + $0x190] sm:$0xff]  ;;  %v452_v49 = vld [vmem:[%s3363_s1 + $0x380] sm:$0xff]  ;;  %v2540_v50 = vpack.c.bf16 %v455_v39, %v453_v37 }
  0x28   : > { %776 = vmatprep.mubr.f32.mxu0 %v253_v40  ;;  %v454_v52 = vld [vmem:[%s3363_s1 + $0x390] sm:$0xff]  ;;  %v393_v53 = vld [vmem:[%s3363_s1 + $0x1a8] sm:$0xff]  ;;  %v459_v58 = vld [vmem:[%s3363_s1 + $0x3b8] sm:$0xff]  ;;  %v1852_v59 = vpack.c.bf16 %v390_v48, %v388_v46 }
  0x29   : > { %1837 = vmatpush1.bf16.msra.mxu1 %v1836_v54  ;;  %v395_v54 = vld [vmem:[%s3363_s1 + $0x1b8] sm:$0xff]  ;;  %v2558_v60 = vpack.c.bf16 %v454_v52, %v452_v49  ;;  %v392_v0 = vld [vmem:[%s3363_s1 + $0x1a0] sm:$0xff]  ;;  %v394_v1 = vld [vmem:[%s3363_s1 + $0x1b0] sm:$0xff] }
  0x2a   : > { %1901 = vmatpush1.bf16.msra.mxu0 %v2430_v55  ;;  %1839 = vmatprep.subr.bf16.mxu1 %v1838_v57  ;;  %v457_v57 = vld [vmem:[%s3363_s1 + $0x3a8] sm:$0xff]  ;;  %v1854_v62 = vpack.c.bf16 %v395_v54, %v393_v53  ;;  %v456_v2 = vld [vmem:[%s3363_s1 + $0x3a0] sm:$0xff]  ;;  %v399_v9 = vld [vmem:[%s3363_s1 + $0x1d8] sm:$0xff]  ;;  %v1856_v15 = vpack.c.bf16 %v394_v1, %v392_v0 }
  0x2b   : > { %1903 = vmatprep.subr.bf16.mxu0 %v2442_v61  ;;  %v2570_v3 = vpack.c.bf16 %v459_v58, %v457_v57  ;;  %v461_v10 = vld [vmem:[%s3363_s1 + $0x3c8] sm:$0xff]  ;;  %v463_v11 = vld [vmem:[%s3363_s1 + $0x3d8] sm:$0xff]  ;;  %v396_v20 = vld [vmem:[%s3363_s1 + $0x1c0] sm:$0xff] }
  0x2c   : > { %v398_v21 = vld [vmem:[%s3363_s1 + $0x1d0] sm:$0xff]  ;;  %v2600_v23 = vpack.c.bf16 %v463_v11, %v461_v10  ;;  %v401_v28 = vld [vmem:[%s3363_s1 + $0x1e8] sm:$0xff]  ;;  %v403_v29 = vld [vmem:[%s3363_s1 + $0x1f8] sm:$0xff] }
  0x2d   : > { %1841 = vmatpush1.bf16.msra.mxu1 %v1840_v5  ;;  %v458_v5 = vld [vmem:[%s3363_s1 + $0x3b0] sm:$0xff]  ;;  %v465_v31 = vld [vmem:[%s3363_s1 + $0x3e8] sm:$0xff]  ;;  %v467_v34 = vld [vmem:[%s3363_s1 + $0x3f8] sm:$0xff]  ;;  %v1860_v35 = vpack.c.bf16 %v398_v21, %v396_v20  ;;  %v1862_v37 = vpack.c.bf16 %v403_v29, %v401_v28 }
  0x2e   : > { %1905 = vmatpush1.bf16.msra.mxu0 %v2461_v6  ;;  %1843 = vmatprep.subr.bf16.mxu1 %v1842_v8  ;;  %v397_v8 = vld [vmem:[%s3363_s1 + $0x1c8] sm:$0xff]  ;;  %v2588_v16 = vpack.c.bf16 %v458_v5, %v456_v2  ;;  %v400_v39 = vld [vmem:[%s3363_s1 + $0x1e0] sm:$0xff]  ;;  %v402_v40 = vld [vmem:[%s3363_s1 + $0x1f0] sm:$0xff] }
  0x2f   : > { %1907 = vmatprep.subr.bf16.mxu0 %v2473_v14  ;;  %v1858_v18 = vpack.c.bf16 %v399_v9, %v397_v8  ;;  %v466_v46 = vld [vmem:[%s3363_s1 + $0x3f0] sm:$0xff]  ;;  %v469_v48 = vld [vmem:[%s3363_s1 + $0x408] sm:$0xff]  ;;  %v471_v49 = vld [vmem:[%s3363_s1 + $0x418] sm:$0xff]  ;;  %v1864_v52 = vpack.c.bf16 %v402_v40, %v400_v39 }
  0x30   : > { %v1930_v54 = vpack.c.bf16 %v471_v49, %v469_v48  ;;  %v468_v57 = vld [vmem:[%s3363_s1 + $0x400] sm:$0xff]  ;;  %v470_v58 = vld [vmem:[%s3363_s1 + $0x410] sm:$0xff]  ;;  %v475_v0 = vld [vmem:[%s3363_s1 + $0x438] sm:$0xff] }
  0x31   : > { %1845 = vmatpush1.bf16.msra.mxu1 %v1844_v22  ;;  %v460_v22 = vld [vmem:[%s3363_s1 + $0x3c0] sm:$0xff]  ;;  %v252_v1 = vld [vmem:[%s2493_s10 + $0x10] sm:$0xff]  ;;  %v1932_v2 = vpack.c.bf16 %v470_v58, %v468_v57  ;;  %v257_v20 = vld [vmem:[%s2493_s10 + $0x38] sm:$0xff] }
  0x32   : > { %1909 = vmatpush1.bf16.msra.mxu0 %v2499_v24  ;;  %1847 = vmatprep.subr.bf16.mxu1 %v1846_v26  ;;  %v462_v26 = vld [vmem:[%s3363_s1 + $0x3d0] sm:$0xff]  ;;  %v258_v8 = vld [vmem:[%s2493_s10 + $0x40] sm:$0xff]  ;;  %v261_v21 = vld [vmem:[%s2493_s10 + $0x58] sm:$0xff] }
  0x33   : > { %1911 = vmatprep.subr.bf16.mxu0 %v2511_v32  ;;  %v2618_v36 = vpack.c.bf16 %v462_v26, %v460_v22  ;;  %v256_v5 = vld [vmem:[%s2493_s10 + $0x30] sm:$0xff]  ;;  %v472_v10 = vld [vmem:[%s3363_s1 + $0x420] sm:$0xff]  ;;  %v263_v22 = vld [vmem:[%s2493_s10 + $0x68] sm:$0xff] }
  0x34   : > { %v474_v11 = vld [vmem:[%s3363_s1 + $0x430] sm:$0xff]  ;;  %v476_v28 = vld [vmem:[%s3363_s1 + $0x440] sm:$0xff]  ;;  %v267_v48 = vld [vmem:[%s2493_s10 + $0x88] sm:$0xff] }
  0x35   : > { %1849 = vmatpush1.bf16.msra.mxu1 %v1848_v42  ;;  %v2627_v42 = vpack.c.bf16 %v467_v34, %v465_v31  ;;  %v478_v29 = vld [vmem:[%s3363_s1 + $0x450] sm:$0xff]  ;;  %v481_v31 = vld [vmem:[%s3363_s1 + $0x468] sm:$0xff]  ;;  %v483_v34 = vld [vmem:[%s3363_s1 + $0x478] sm:$0xff] }
  0x36   : > { %1913 = vmatpush1.bf16.msra.mxu0 %v2528_v44  ;;  %1851 = vmatprep.subr.bf16.mxu1 %v1850_v45  ;;  %v464_v45 = vld [vmem:[%s3363_s1 + $0x3e0] sm:$0xff]  ;;  %v1940_v39 = vpack.c.bf16 %v478_v29, %v476_v28  ;;  %v1942_v40 = vpack.c.bf16 %v483_v34, %v481_v31  ;;  %v271_v49 = vld [vmem:[%s2493_s10 + $0xa8] sm:$0xff]  ;;  %v272_v57 = vld [vmem:[%s2493_s10 + $0xb0] sm:$0xff] }
  0x37   : > { %1915 = vmatprep.subr.bf16.mxu0 %v2540_v50  ;;  %v2642_v53 = vpack.c.bf16 %v466_v46, %v464_v45  ;;  %v480_v45 = vld [vmem:[%s3363_s1 + $0x460] sm:$0xff]  ;;  %v482_v46 = vld [vmem:[%s3363_s1 + $0x470] sm:$0xff]  ;;  %v297_v29 = vld [vmem:[%s2493_s10 + $0x178] sm:$0xff] }
  0x38   : > { %v276_v58 = vld [vmem:[%s2493_s10 + $0xd0] sm:$0xff]  ;;  %v298_v28 = vld [vmem:[%s2493_s10 + $0x180] sm:$0xff] }
  0x39   : > { %1853 = vmatpush1.bf16.msra.mxu1 %v1852_v59  ;;  %v250_v59 = vld [vmem:[%s2493_s10] sm:$0xff]  ;;  %v304_v34 = vld [vmem:[%s2493_s10 + $0x1b0] sm:$0xff] }
  0x3a   : > { %1917 = vmatpush1.bf16.msra.mxu0 %v2558_v60  ;;  %1855 = vmatprep.subr.bf16.mxu1 %v1854_v62  ;;  %v473_v62 = vld [vmem:[%s3363_s1 + $0x428] sm:$0xff]  ;;  %v302_v31 = vld [vmem:[%s2493_s10 + $0x1a0] sm:$0xff] }
  0x3b   : > { %1919 = vmatprep.subr.bf16.mxu0 %v2570_v3  ;;  %v1934_v9 = vpack.c.bf16 %v475_v0, %v473_v62  ;;  %v281_v62 = vld [vmem:[%s2493_s10 + $0xf8] sm:$0xff]  ;;  %v283_v0 = vld [vmem:[%s2493_s10 + $0x108] sm:$0xff] }
  0x3d   : > { %1857 = vmatpush1.bf16.msra.mxu1 %v1856_v15  ;;  %v477_v15 = vld [vmem:[%s3363_s1 + $0x448] sm:$0xff] }
  0x3e   : > { %1921 = vmatpush1.bf16.msra.mxu0 %v2588_v16  ;;  %1859 = vmatprep.subr.bf16.mxu1 %v1858_v18  ;;  %v479_v18 = vld [vmem:[%s3363_s1 + $0x458] sm:$0xff] }
  0x3f   : > { %1923 = vmatprep.subr.bf16.mxu0 %v2600_v23  ;;  %v1938_v26 = vpack.c.bf16 %v479_v18, %v477_v15  ;;  %v306_v15 = vld [vmem:[%s2493_s10 + $0x1c0] sm:$0xff]  ;;  %v311_v18 = vld [vmem:[%s2493_s10 + $0x1e8] sm:$0xff] }
  0x41   : > { %1861 = vmatpush1.bf16.msra.mxu1 %v1860_v35  ;;  %v262_v35 = vld [vmem:[%s2493_s10 + $0x60] sm:$0xff] }
  0x42   : > { %1925 = vmatpush1.bf16.msra.mxu0 %v2618_v36  ;;  %1863 = vmatprep.subr.bf16.mxu1 %v1862_v37  ;;  %v266_v37 = vld [vmem:[%s2493_s10 + $0x80] sm:$0xff] }
  0x43   : > { %1927 = vmatprep.subr.bf16.mxu0 %v2627_v42 }
  0x45   : > { %1865 = vmatpush1.bf16.msra.mxu1 %v1864_v52  ;;  %v273_v52 = vld [vmem:[%s2493_s10 + $0xb8] sm:$0xff] }
  0x46   : > { %1929 = vmatpush1.bf16.msra.mxu0 %v2642_v53  ;;  %1946 = vmatprep.subr.bf16.mxu1 %v2160_v7  ;;  %v255_v7 = vld [vmem:[%s2493_s10 + $0x28] sm:$0xff] }
  0x47   : > { %1931 = vmatprep.subr.bf16.mxu0 %v1930_v54  ;;  %v1944_v54 = vpack.c.bf16 %v482_v46, %v480_v45  ;;  %v314_v45 = vld [vmem:[%s2493_s10 + $0x200] sm:$0xff] }
  0x48   : > { %604 = vmatmul.mubr.f32.vlgmr.msra.gmra.mrb[0].mxu1 %v250_v59  ;;  %v275_v59 = vld [vmem:[%s2493_s10 + $0xc8] sm:$0xff]  ;;  %v318_v46 = vld [vmem:[%s2493_s10 + $0x220] sm:$0xff] }
  0x49   : > { %777 = vmatmul.mubr.f32.vlgmr.msra.gmra.mrb[0].mxu0 %v252_v1  ;;  %1962 = vmatpush1.bf16.msra.mxu1 %v2171_v12  ;;  %v1936_v12 = vpack.c.bf16 %v474_v11, %v472_v10  ;;  %v282_v1 = vld [vmem:[%s2493_s10 + $0x100] sm:$0xff]  ;;  %v296_v10 = vld [vmem:[%s2493_s10 + $0x170] sm:$0xff] }
  0x4a   : > { %1933 = vmatpush1.bf16.msra.mxu0 %v1932_v2  ;;  %609 = vmatprep.mubr.f32.mxu1 %v256_v5  ;;  %v286_v2 = vld [vmem:[%s2493_s10 + $0x120] sm:$0xff]  ;;  %v287_v5 = vld [vmem:[%s2493_s10 + $0x128] sm:$0xff] }
  0x4b   : > { %782 = vmatprep.mubr.f32.mxu0 %v258_v8  ;;  %1947 = vmatprep.subr.bf16.mxu1 %v2183_v17  ;;  %v260_v17 = vld [vmem:[%s2493_s10 + $0x50] sm:$0xff]  ;;  %v291_v8 = vld [vmem:[%s2493_s10 + $0x148] sm:$0xff]  ;;  %v254_v11 = vld [vmem:[%s2493_s10 + $0x20] sm:$0xff] }
  0x4c   : > { %610 = vmatmul.mubr.f32.gmra.mrb[2].mxu1 %v255_v7  ;;  %1935 = vmatprep.subr.bf16.mxu0 %v1934_v9  ;;  %v293_v9 = vld [vmem:[%s2493_s10 + $0x158] sm:$0xff] }
  0x4d   : > { %783 = vmatmul.mubr.f32.gmra.mrb[2].mxu0 %v257_v20  ;;  %1963 = vmatpush1.bf16.msra.mxu1 %v2205_v25  ;;  %v268_v25 = vld [vmem:[%s2493_s10 + $0x90] sm:$0xff]  ;;  %v301_v7 = vld [vmem:[%s2493_s10 + $0x198] sm:$0xff] }
  0x4e   : > { %615 = vmatprep.mubr.f32.mxu1 %v261_v21  ;;  %788 = vmatprep.mubr.f32.mxu0 %v263_v22  ;;  %v316_v20 = vld [vmem:[%s2493_s10 + $0x210] sm:$0xff]  ;;  %v321_v21 = vld [vmem:[%s2493_s10 + $0x238] sm:$0xff]  ;;  %v326_v22 = vld [vmem:[%s2493_s10 + $0x260] sm:$0xff] }
  0x4f   : > { %1948 = vmatprep.subr.bf16.mxu1 %v2216_v30  ;;  %1937 = vmatpush1.bf16.msra.mxu0 %v1936_v12  ;;  %v265_v30 = vld [vmem:[%s2493_s10 + $0x78] sm:$0xff]  ;;  %v331_v12 = vld [vmem:[%s2493_s10 + $0x288] sm:$0xff] }
  0x50   : > { %616 = vmatmul.mubr.f32.gmra.mrb[4].mxu1 %v260_v17  ;;  %1939 = vmatprep.subr.bf16.mxu0 %v1938_v26  ;;  %v336_v26 = vld [vmem:[%s2493_s10 + $0x2b0] sm:$0xff]  ;;  %v303_v17 = vld [vmem:[%s2493_s10 + $0x1a8] sm:$0xff] }
  0x51   : > { %789 = vmatmul.mubr.f32.gmra.mrb[4].mxu0 %v262_v35  ;;  %1964 = vmatpush1.bf16.msra.mxu1 %v2237_v38  ;;  %v270_v38 = vld [vmem:[%s2493_s10 + $0xa0] sm:$0xff]  ;;  %v308_v35 = vld [vmem:[%s2493_s10 + $0x1d0] sm:$0xff] }
  0x52   : > { %621 = vmatprep.mubr.f32.mxu1 %v266_v37  ;;  %794 = vmatprep.mubr.f32.mxu0 %v268_v25  ;;  %v307_v37 = vld [vmem:[%s2493_s10 + $0x1c8] sm:$0xff]  ;;  %v309_v25 = vld [vmem:[%s2493_s10 + $0x1d8] sm:$0xff] }
  0x53   : > { %1949 = vmatprep.subr.bf16.mxu1 %v2249_v43  ;;  %1941 = vmatpush1.bf16.msra.mxu0 %v1940_v39  ;;  %v278_v43 = vld [vmem:[%s2493_s10 + $0xe0] sm:$0xff]  ;;  %v313_v39 = vld [vmem:[%s2493_s10 + $0x1f8] sm:$0xff] }
  0x54   : > { %622 = vmatmul.mubr.f32.gmra.mrb[6].mxu1 %v265_v30  ;;  %1943 = vmatprep.subr.bf16.mxu0 %v1942_v40  ;;  %v312_v40 = vld [vmem:[%s2493_s10 + $0x1f0] sm:$0xff]  ;;  %v317_v30 = vld [vmem:[%s2493_s10 + $0x218] sm:$0xff] }
  0x55   : > { %795 = vmatmul.mubr.f32.gmra.mrb[6].mxu0 %v267_v48  ;;  %627 = vmatprep.mubr.f32.mxu1 %v271_v49  ;;  %v319_v48 = vld [vmem:[%s2493_s10 + $0x228] sm:$0xff] }
  0x56   : > { %1965 = vmatpush1.bf16.msra.mxu1 %v2270_v51  ;;  %800 = vmatprep.mubr.f32.mxu0 %v273_v52  ;;  %v277_v51 = vld [vmem:[%s2493_s10 + $0xd8] sm:$0xff]  ;;  %v323_v49 = vld [vmem:[%s2493_s10 + $0x248] sm:$0xff]  ;;  %v322_v52 = vld [vmem:[%s2493_s10 + $0x240] sm:$0xff] }
  0x57   : > { %1950 = vmatprep.subr.bf16.mxu1 %v2282_v56  ;;  %1945 = vmatpush1.bf16.msra.mxu0 %v1944_v54  ;;  %v280_v56 = vld [vmem:[%s2493_s10 + $0xf0] sm:$0xff] }
  0x58   : > { %628 = vmatmul.mubr.f32.gmra.mrb[8].mxu1 %v270_v38  ;;  %v324_v54 = vld [vmem:[%s2493_s10 + $0x250] sm:$0xff] }
  0x59   : > { %801 = vmatmul.mubr.f32.gmra.mrb[8].mxu0 %v272_v57  ;;  %633 = vmatprep.mubr.f32.mxu1 %v276_v58  ;;  %v328_v38 = vld [vmem:[%s2493_s10 + $0x270] sm:$0xff]  ;;  %v327_v57 = vld [vmem:[%s2493_s10 + $0x268] sm:$0xff]  ;;  %v329_v58 = vld [vmem:[%s2493_s10 + $0x278] sm:$0xff] }
  0x5a   : > { %1966 = vmatpush1.bf16.msra.mxu1 %v2300_v63  ;;  %806 = vmatprep.mubr.f32.mxu0 %v278_v43  ;;  %v288_v63 = vld [vmem:[%s2493_s10 + $0x130] sm:$0xff]  ;;  %v333_v43 = vld [vmem:[%s2493_s10 + $0x298] sm:$0xff] }
  0x5b   : > { %1951 = vmatprep.subr.bf16.mxu1 %v2312_v4  ;;  %v285_v4 = vld [vmem:[%s2493_s10 + $0x118] sm:$0xff] }
  0x5c   : > { %634 = vmatmul.mubr.f32.gmra.mrb[10].mxu1 %v275_v59  ;;  %v332_v59 = vld [vmem:[%s2493_s10 + $0x290] sm:$0xff] }
  0x5d   : > { %807 = vmatmul.mubr.f32.gmra.mrb[10].mxu0 %v277_v51  ;;  %639 = vmatprep.mubr.f32.mxu1 %v281_v62  ;;  %v334_v51 = vld [vmem:[%s2493_s10 + $0x2a0] sm:$0xff] }
  0x5e   : > { %812 = vmatprep.mubr.f32.mxu0 %v283_v0  ;;  %1967 = vmatpush1.bf16.msra.mxu1 %v2330_v13  ;;  %v290_v13 = vld [vmem:[%s2493_s10 + $0x140] sm:$0xff]  ;;  %v337_v0 = vld [vmem:[%s2493_s10 + $0x2b8] sm:$0xff] }
  0x5f   : > { %1952 = vmatprep.subr.bf16.mxu1 %v2342_v19  ;;  %v292_v19 = vld [vmem:[%s2493_s10 + $0x150] sm:$0xff]  ;;  %v338_v62 = vld [vmem:[%s2493_s10 + $0x2c0] sm:$0xff] }
  0x60   : > { %640 = vmatmul.mubr.f32.gmra.mrb[12].mxu1 %v280_v56  ;;  %v339_v56 = vld [vmem:[%s2493_s10 + $0x2c8] sm:$0xff] }
  0x61   : > { %813 = vmatmul.mubr.f32.gmra.mrb[12].mxu0 %v282_v1  ;;  %645 = vmatprep.mubr.f32.mxu1 %v286_v2 }
  0x62   : > { %818 = vmatprep.mubr.f32.mxu0 %v288_v63  ;;  %1968 = vmatpush1.bf16.msra.mxu1 %v2364_v27  ;;  %v295_v27 = vld [vmem:[%s2493_s10 + $0x168] sm:$0xff] }
  0x63   : > { %1953 = vmatprep.subr.bf16.mxu1 %v2376_v33  ;;  %v2107_v33 = vmov 0.0  }
  0x64   : > { %646 = vmatmul.mubr.f32.gmra.mrb[14].mxu1 %v285_v4 }
  0x65   : > { %819 = vmatmul.mubr.f32.gmra.mrb[14].mxu0 %v287_v5  ;;  %651 = vmatprep.mubr.f32.mxu1 %v291_v8 }
  0x66   : > { %824 = vmatprep.mubr.f32.mxu0 %v293_v9  ;;  %1969 = vmatpush1.bf16.msra.mxu1 %v2395_v41  ;;  %v300_v41 = vld [vmem:[%s2493_s10 + $0x190] sm:$0xff] }
  0x67   : > { %1954 = vmatprep.subr.bf16.mxu1 %v2407_v47  ;;  %v259_v47 = vld [vmem:[%s2493_s10 + $0x48] sm:$0xff] }
  0x68   : > { %652 = vmatmul.mubr.f32.gmra.mrb[16].mxu1 %v290_v13 }
  0x69   : > { %825 = vmatmul.mubr.f32.gmra.mrb[16].mxu0 %v292_v19  ;;  %657 = vmatprep.mubr.f32.mxu1 %v296_v10 }
  0x6a   : > { %949 = vmatprep.mubr.f32.mxu0 %v2107_v33  ;;  %1970 = vmatpush1.bf16.msra.mxu1 %v2430_v55  ;;  %v305_v55 = vld [vmem:[%s2493_s10 + $0x1b8] sm:$0xff] }
  0x6b   : > { %1955 = vmatprep.subr.bf16.mxu1 %v2442_v61  ;;  %v264_v61 = vld [vmem:[%s2493_s10 + $0x70] sm:$0xff] }
  0x6c   : > { %658 = vmatmul.mubr.f32.gmra.mrb[18].mxu1 %v295_v27 }
  0x6d   : > { %1781 = vmatmul.mubr.msk.f32.vlgmr.msra.gmra.mrb[0].mxu0 %vm484_vm0, %v254_v11  ;;  %663 = vmatprep.mubr.f32.mxu1 %v301_v7 }
  0x6e   : > { %955 = vmatprep.mubr.f32.mxu0 %v2107_v33  ;;  %1971 = vmatpush1.bf16.msra.mxu1 %v2461_v6  ;;  %v310_v6 = vld [vmem:[%s2493_s10 + $0x1e0] sm:$0xff] }
  0x6f   : > { %1956 = vmatprep.subr.bf16.mxu1 %v2473_v14  ;;  %v269_v14 = vld [vmem:[%s2493_s10 + $0x98] sm:$0xff] }
  0x70   : > { %664 = vmatmul.mubr.f32.gmra.mrb[20].mxu1 %v300_v41 }
  0x71   : > { %1782 = vmatmul.mubr.msk.f32.gmra.mrb[2].mxu0 %vm484_vm0, %v259_v47  ;;  %669 = vmatprep.mubr.f32.mxu1 %v306_v15 }
  0x72   : > { %961 = vmatprep.mubr.f32.mxu0 %v2107_v33  ;;  %1972 = vmatpush1.bf16.msra.mxu1 %v2499_v24  ;;  %v315_v24 = vld [vmem:[%s2493_s10 + $0x208] sm:$0xff] }
  0x73   : > { %1957 = vmatprep.subr.bf16.mxu1 %v2511_v32  ;;  %v274_v32 = vld [vmem:[%s2493_s10 + $0xc0] sm:$0xff] }
  0x74   : > { %670 = vmatmul.mubr.f32.gmra.mrb[22].mxu1 %v305_v55 }
  0x75   : > { %1783 = vmatmul.mubr.msk.f32.gmra.mrb[4].mxu0 %vm484_vm0, %v264_v61  ;;  %675 = vmatprep.mubr.f32.mxu1 %v311_v18 }
  0x76   : > { %967 = vmatprep.mubr.f32.mxu0 %v2107_v33  ;;  %1973 = vmatpush1.bf16.msra.mxu1 %v2528_v44  ;;  %v320_v44 = vld [vmem:[%s2493_s10 + $0x230] sm:$0xff] }
  0x77   : > { %1958 = vmatprep.subr.bf16.mxu1 %v2540_v50  ;;  %v279_v50 = vld [vmem:[%s2493_s10 + $0xe8] sm:$0xff] }
  0x78   : > { %676 = vmatmul.mubr.f32.gmra.mrb[24].mxu1 %v310_v6 }
  0x79   : > { %1784 = vmatmul.mubr.msk.f32.gmra.mrb[6].mxu0 %vm484_vm0, %v269_v14  ;;  %681 = vmatprep.mubr.f32.mxu1 %v316_v20 }
  0x7a   : > { %973 = vmatprep.mubr.f32.mxu0 %v2107_v33  ;;  %1974 = vmatpush1.bf16.msra.mxu1 %v2558_v60  ;;  %v325_v60 = vld [vmem:[%s2493_s10 + $0x258] sm:$0xff] }
  0x7b   : > { %1959 = vmatprep.subr.bf16.mxu1 %v2570_v3  ;;  %v284_v3 = vld [vmem:[%s2493_s10 + $0x110] sm:$0xff] }
  0x7c   : > { %682 = vmatmul.mubr.f32.gmra.mrb[26].mxu1 %v315_v24 }
  0x7d   : > { %1785 = vmatmul.mubr.msk.f32.gmra.mrb[8].mxu0 %vm484_vm0, %v274_v32  ;;  %687 = vmatprep.mubr.f32.mxu1 %v321_v21 }
  0x7e   : > { %979 = vmatprep.mubr.f32.mxu0 %v2107_v33  ;;  %1975 = vmatpush1.bf16.msra.mxu1 %v2588_v16  ;;  %v330_v16 = vld [vmem:[%s2493_s10 + $0x280] sm:$0xff] }
  0x7f   : > { %1960 = vmatprep.subr.bf16.mxu1 %v2600_v23  ;;  %v289_v23 = vld [vmem:[%s2493_s10 + $0x138] sm:$0xff] }
  0x80   : > { %688 = vmatmul.mubr.f32.gmra.mrb[28].mxu1 %v320_v44 }
  0x81   : > { %1786 = vmatmul.mubr.msk.f32.gmra.mrb[10].mxu0 %vm484_vm0, %v279_v50  ;;  %693 = vmatprep.mubr.f32.mxu1 %v326_v22 }
  0x82   : > { %985 = vmatprep.mubr.f32.mxu0 %v2107_v33  ;;  %1976 = vmatpush1.bf16.msra.mxu1 %v2618_v36  ;;  %v335_v36 = vld [vmem:[%s2493_s10 + $0x2a8] sm:$0xff] }
  0x83   : > { %1961 = vmatprep.subr.bf16.mxu1 %v2627_v42  ;;  %v294_v42 = vld [vmem:[%s2493_s10 + $0x160] sm:$0xff] }
  0x84   : > { %694 = vmatmul.mubr.f32.gmra.mrb[30].mxu1 %v325_v60 }
  0x85   : > { %1787 = vmatmul.mubr.msk.f32.gmra.mrb[12].mxu0 %vm484_vm0, %v284_v3  ;;  %699 = vmatprep.mubr.f32.mxu1 %v331_v12 }
  0x86   : > { %991 = vmatprep.mubr.f32.mxu0 %v2107_v33  ;;  %1977 = vmatpush1.bf16.msra.mxu1 %v2642_v53  ;;  %v299_v53 = vld [vmem:[%s2493_s10 + $0x188] sm:$0xff]  ;;  %s1777_s10 = sshll.u32 %s3368_s17, 3 }
  0x87   : > { %s3163_s27 = scalar_lea.vmem %s3365_s3, %s1777_s10  ;;  %s3196_s30 = scalar_lea.vmem %s3364_s2, %s1777_s10 }
  0x88   : > { %700 = vmatmul.mubr.f32.gmra.mrb[32].mxu1 %v330_v16 }
  0x89   : > { %1788 = vmatmul.mubr.msk.f32.gmra.mrb[14].mxu0 %vm484_vm0, %v289_v23  ;;  %705 = vmatprep.mubr.f32.mxu1 %v336_v26 }
  0x8a   : > { %997 = vmatprep.mubr.f32.mxu0 %v2107_v33 }
  0x8c   : > { %706 = vmatmul.mubr.f32.gmra.mrb[34].mxu1 %v335_v36 }
  0x8d   : > { %1789 = vmatmul.mubr.msk.f32.gmra.mrb[16].mxu0 %vm484_vm0, %v294_v42  ;;  %830 = vmatprep.mubr.f32.mxu1 %v298_v28 }
  0x8e   : > { %1003 = vmatprep.mubr.f32.mxu0 %v2107_v33 }
  0x90   : > { %831 = vmatmul.mubr.f32.vlgmr.msra.gmra.mrb[18].mxu1 %v297_v29 }
  0x91   : > { %1790 = vmatmul.mubr.msk.f32.gmra.mrb[18].mxu0 %vm484_vm0, %v299_v53  ;;  %836 = vmatprep.mubr.f32.mxu1 %v303_v17 }
  0x92   : > { %1009 = vmatprep.mubr.f32.mxu0 %v2107_v33 }
  0x94   : > { %837 = vmatmul.mubr.f32.gmra.mrb[20].mxu1 %v302_v31 }
  0x95   : > { %1791 = vmatmul.mubr.msk.f32.gmra.mrb[20].mxu0 %vm484_vm0, %v304_v34  ;;  %842 = vmatprep.mubr.f32.mxu1 %v308_v35 }
  0x96   : > { %1015 = vmatprep.mubr.f32.mxu0 %v2107_v33 }
  0x98   : > { %843 = vmatmul.mubr.f32.gmra.mrb[22].mxu1 %v307_v37 }
  0x99   : > { %1792 = vmatmul.mubr.msk.f32.gmra.mrb[22].mxu0 %vm484_vm0, %v309_v25  ;;  %848 = vmatprep.mubr.f32.mxu1 %v313_v39 }
  0x9a   : > { %1021 = vmatprep.mubr.f32.mxu0 %v2107_v33 }
  0x9c   : > { %849 = vmatmul.mubr.f32.gmra.mrb[24].mxu1 %v312_v40 }
  0x9d   : > { %1793 = vmatmul.mubr.msk.f32.gmra.mrb[24].mxu0 %vm484_vm0, %v314_v45  ;;  %854 = vmatprep.mubr.f32.mxu1 %v318_v46 }
  0x9e   : > { %1027 = vmatprep.mubr.f32.mxu0 %v2107_v33 }
  0xa0   : > { %855 = vmatmul.mubr.f32.gmra.mrb[26].mxu1 %v317_v30 }
  0xa1   : > { %1794 = vmatmul.mubr.msk.f32.gmra.mrb[26].mxu0 %vm484_vm0, %v319_v48  ;;  %860 = vmatprep.mubr.f32.mxu1 %v323_v49 }
  0xa2   : > { %1033 = vmatprep.mubr.f32.mxu0 %v2107_v33 }
  0xa4   : > { %861 = vmatmul.mubr.f32.gmra.mrb[28].mxu1 %v322_v52 }
  0xa5   : > { %1795 = vmatmul.mubr.msk.f32.gmra.mrb[28].mxu0 %vm484_vm0, %v324_v54  ;;  %866 = vmatprep.mubr.f32.mxu1 %v328_v38 }
  0xa6   : > { %1039 = vmatprep.mubr.f32.mxu0 %v2107_v33 }
  0xa8   : > { %867 = vmatmul.mubr.f32.gmra.mrb[30].mxu1 %v327_v57 }
  0xa9   : > { %1796 = vmatmul.mubr.msk.f32.gmra.mrb[30].mxu0 %vm484_vm0, %v329_v58  ;;  %872 = vmatprep.mubr.f32.mxu1 %v333_v43 }
  0xaa   : > { %1045 = vmatprep.mubr.f32.mxu0 %v2107_v33 }
  0xac   : > { %873 = vmatmul.mubr.f32.gmra.mrb[32].mxu1 %v332_v59 }
  0xad   : > { %1797 = vmatmul.mubr.msk.f32.gmra.mrb[32].mxu0 %vm484_vm0, %v334_v51  ;;  %878 = vmatprep.mubr.f32.mxu1 %v338_v62 }
  0xae   : > { %1051 = vmatprep.mubr.f32.mxu0 %v2107_v33 }
  0xb0   : > { %879 = vmatmul.mubr.f32.gmra.mrb[34].mxu1 %v337_v0 }
  0xb1   : > { %1798 = vmatmul.mubr.msk.f32.gmra.mrb[34].mxu0 %vm484_vm0, %v339_v56 }
 0x11b   : > { %v605_v1 = vpop.f32.mrb[0].mxu1 }
 0x11c   : > { %v607_v2 = vpop.f32.mrb[1].mxu1 }
 0x11f   : > { %v611_v63 = vpop.f32.mrb[2].mxu1 }
 0x120   : > { %v613_v4 = vpop.f32.mrb[3].mxu1 }
 0x123   : > { %v617_v5 = vpop.f32.mrb[4].mxu1 }
 0x124   : > { %v619_v8 = vpop.f32.mrb[5].mxu1 }
 0x127   : > { %v623_v9 = vpop.f32.mrb[6].mxu1 }
 0x128   : > { %v625_v13 = vpop.f32.mrb[7].mxu1 }
 0x12b   : > { %v629_v19 = vpop.f32.mrb[8].mxu1 }
 0x12c   : > { %v631_v10 = vpop.f32.mrb[9].mxu1 }
 0x12f   : > { %v635_v27 = vpop.f32.mrb[10].mxu1 }
 0x130   : > { %v637_v11 = vpop.f32.mrb[11].mxu1 }
 0x133   : > { %v641_v7 = vpop.f32.mrb[12].mxu1 }
 0x134   : > { %v643_v41 = vpop.f32.mrb[13].mxu1 }
 0x137   : > { %v647_v47 = vpop.f32.mrb[14].mxu1 }
 0x138   : > { %v649_v33 = vpop.f32.mrb[15].mxu1 }
 0x13b   : > { %v653_v15 = vpop.f32.mrb[16].mxu1 }
 0x13c   : > { %v655_v55 = vpop.f32.mrb[17].mxu1 }
 0x140   : > { %v951_v61 = vpop.f32.mrb[0].mxu0 }
 0x141   : > { %v2844_v18 = vadd.f32 %v951_v61, %v605_v1  ;;  %v953_v6 = vpop.f32.mrb[1].mxu0 }
 0x142   : > { %v2846_v14 = vadd.f32 %v953_v6, %v607_v2 }
 0x144   : > { %v957_v20 = vpop.f32.mrb[2].mxu0  ;;  %v1059_v24 = vsel %vm1058_vm1, %v2846_v14, 0.0 }
 0x145   : > { %v2850_v32 = vadd.f32 %v957_v20, %v611_v63  ;;  %v959_v21 = vpop.f32.mrb[3].mxu0  ;;  %v1060_v44 = vadd.f32 %v2844_v18, %v1059_v24 }
 0x146   : > { %v2853_v50 = vadd.f32 %v959_v21, %v613_v4 }
 0x147   : > { %1061 = vadd.xlane.f32.xlu0 %v1060_v44 }
 0x148   : > { %v963_v22 = vpop.f32.mrb[4].mxu0  ;;  %v1063_v60 = vsel %vm1058_vm1, %v2853_v50, 0.0 }
 0x149   : > { %v2857_v3 = vadd.f32 %v963_v22, %v617_v5  ;;  %v965_v12 = vpop.f32.mrb[5].mxu0  ;;  %v1064_v16 = vadd.f32 %v2850_v32, %v1063_v60 }
 0x14a   : > { %v2860_v23 = vadd.f32 %v965_v12, %v619_v8 }
 0x14b   : > { %1065 = vadd.xlane.f32.xlu0 %v1064_v16 }
 0x14c   : > { %v969_v26 = vpop.f32.mrb[6].mxu0  ;;  %v1067_v36 = vsel %vm1058_vm1, %v2860_v23, 0.0 }
 0x14d   : > { %v2864_v42 = vadd.f32 %v969_v26, %v623_v9  ;;  %v971_v28 = vpop.f32.mrb[7].mxu0  ;;  %v1068_v29 = vadd.f32 %v2857_v3, %v1067_v36 }
 0x14e   : > { %v2867_v53 = vadd.f32 %v971_v28, %v625_v13 }
 0x14f   : > { %1069 = vadd.xlane.f32.xlu1 %v1068_v29 }
 0x150   : > { %v975_v17 = vpop.f32.mrb[8].mxu0  ;;  %v1071_v31 = vsel %vm1058_vm1, %v2867_v53, 0.0 }
 0x151   : > { %v2871_v34 = vadd.f32 %v975_v17, %v629_v19  ;;  %v977_v35 = vpop.f32.mrb[9].mxu0  ;;  %v1072_v37 = vadd.f32 %v2864_v42, %v1071_v31 }
 0x152   : > { %v2874_v25 = vadd.f32 %v977_v35, %v631_v10 }
 0x153   : > { %1073 = vadd.xlane.f32.xlu1 %v1072_v37 }
 0x154   : > { %v981_v39 = vpop.f32.mrb[10].mxu0  ;;  %v1075_v40 = vsel %vm1058_vm1, %v2874_v25, 0.0 }
 0x155   : > { %v2878_v45 = vadd.f32 %v981_v39, %v635_v27  ;;  %v983_v46 = vpop.f32.mrb[11].mxu0  ;;  %v1076_v30 = vadd.f32 %v2871_v34, %v1075_v40 }
 0x156   : > { %v2881_v48 = vadd.f32 %v983_v46, %v637_v11 }
 0x157   : > { %1077 = vadd.xlane.f32.xlu0 %v1076_v30 }
 0x158   : > { %v987_v49 = vpop.f32.mrb[12].mxu0  ;;  %v1079_v52 = vsel %vm1058_vm1, %v2881_v48, 0.0 }
 0x159   : > { %v2885_v54 = vadd.f32 %v987_v49, %v641_v7  ;;  %v989_v38 = vpop.f32.mrb[13].mxu0  ;;  %v1080_v57 = vadd.f32 %v2878_v45, %v1079_v52 }
 0x15a   : > { %v2888_v58 = vadd.f32 %v989_v38, %v643_v41 }
 0x15b   : > { %1081 = vadd.xlane.f32.xlu1 %v1080_v57 }
 0x15c   : > { %v993_v43 = vpop.f32.mrb[14].mxu0  ;;  %v1083_v59 = vsel %vm1058_vm1, %v2888_v58, 0.0 }
 0x15d   : > { %v2892_v51 = vadd.f32 %v993_v43, %v647_v47  ;;  %v995_v62 = vpop.f32.mrb[15].mxu0  ;;  %v1084_v0 = vadd.f32 %v2885_v54, %v1083_v59 }
 0x15e   : > { %v2895_v56 = vadd.f32 %v995_v62, %v649_v33 }
 0x15f   : > { %1085 = vadd.xlane.f32.xlu0 %v1084_v0 }
 0x160   : > { %v999_v1 = vpop.f32.mrb[16].mxu0  ;;  %v1087_v2 = vsel %vm1058_vm1, %v2895_v56, 0.0 }
 0x161   : > { %v2899_v63 = vadd.f32 %v999_v1, %v653_v15  ;;  %v1001_v4 = vpop.f32.mrb[17].mxu0  ;;  %v1088_v5 = vadd.f32 %v2892_v51, %v1087_v2 }
 0x162   : > { %v2902_v8 = vadd.f32 %v1001_v4, %v655_v55 }
 0x163   : > { %1089 = vadd.xlane.f32.xlu1 %v1088_v5  ;;  %v832_v9 = vpop.f32.mrb[18].mxu1 }
 0x164   : > { %v1005_v13 = vpop.f32.mrb[18].mxu0  ;;  %v834_v19 = vpop.f32.mrb[19].mxu1  ;;  %v1091_v10 = vsel %vm1058_vm1, %v2902_v8, 0.0 }
 0x165   : > { %v2906_v27 = vadd.f32 %v1005_v13, %v832_v9  ;;  %v1007_v11 = vpop.f32.mrb[19].mxu0  ;;  %v1092_v7 = vadd.f32 %v2899_v63, %v1091_v10 }
 0x166   : > { %v2909_v41 = vadd.f32 %v1007_v11, %v834_v19 }
 0x167   : > { %1093 = vadd.xlane.f32.xlu0 %v1092_v7  ;;  %v838_v47 = vpop.f32.mrb[20].mxu1 }
 0x168   : > { %v1011_v33 = vpop.f32.mrb[20].mxu0  ;;  %v840_v15 = vpop.f32.mrb[21].mxu1  ;;  %v1095_v55 = vsel %vm1058_vm1, %v2909_v41, 0.0 }
 0x169   : > { %v2913_v61 = vadd.f32 %v1011_v33, %v838_v47  ;;  %v1013_v6 = vpop.f32.mrb[21].mxu0  ;;  %v1096_v20 = vadd.f32 %v2906_v27, %v1095_v55 }
 0x16a   : > { %v2916_v24 = vadd.f32 %v1013_v6, %v840_v15 }
 0x16b   : > { %1097 = vadd.xlane.f32.xlu1 %v1096_v20  ;;  %v844_v21 = vpop.f32.mrb[22].mxu1 }
 0x16c   : > { %v1017_v44 = vpop.f32.mrb[22].mxu0  ;;  %v846_v22 = vpop.f32.mrb[23].mxu1  ;;  %v1099_v60 = vsel %vm1058_vm1, %v2916_v24, 0.0 }
 0x16d   : > { %v2920_v12 = vadd.f32 %v1017_v44, %v844_v21  ;;  %v1019_v16 = vpop.f32.mrb[23].mxu0  ;;  %v1100_v26 = vadd.f32 %v2913_v61, %v1099_v60 }
 0x16e   : > { %v2923_v36 = vadd.f32 %v1019_v16, %v846_v22 }
 0x16f   : > { %1101 = vadd.xlane.f32.xlu0 %v1100_v26  ;;  %v850_v28 = vpop.f32.mrb[24].mxu1 }
 0x170   : > { %v1023_v29 = vpop.f32.mrb[24].mxu0  ;;  %v852_v17 = vpop.f32.mrb[25].mxu1  ;;  %v1103_v31 = vsel %vm1058_vm1, %v2923_v36, 0.0 }
 0x171   : > { %v2927_v35 = vadd.f32 %v1023_v29, %v850_v28  ;;  %v1025_v37 = vpop.f32.mrb[25].mxu0  ;;  %v1104_v39 = vadd.f32 %v2920_v12, %v1103_v31 }
 0x172   : > { %v2930_v40 = vadd.f32 %v1025_v37, %v852_v17 }
 0x173   : > { %1105 = vadd.xlane.f32.xlu1 %v1104_v39  ;;  %v856_v46 = vpop.f32.mrb[26].mxu1 }
 0x174   : > { %v1029_v30 = vpop.f32.mrb[26].mxu0  ;;  %v858_v49 = vpop.f32.mrb[27].mxu1  ;;  %v1107_v52 = vsel %vm1058_vm1, %v2930_v40, 0.0 }
 0x175   : > { %v2934_v38 = vadd.f32 %v1029_v30, %v856_v46  ;;  %v1031_v57 = vpop.f32.mrb[27].mxu0  ;;  %v1108_v43 = vadd.f32 %v2927_v35, %v1107_v52 }
 0x176   : > { %v2937_v59 = vadd.f32 %v1031_v57, %v858_v49  ;;  %v2108_v57 = vmov 0  }
 0x177   : > { %1109 = vadd.xlane.f32.xlu0 %v1108_v43  ;;  %v862_v62 = vpop.f32.mrb[28].mxu1  ;;  %2061 = vset.pattern.permute.xlu1 %v2108_v57 }
 0x178   : > { %v1035_v0 = vpop.f32.mrb[28].mxu0  ;;  %v864_v1 = vpop.f32.mrb[29].mxu1  ;;  %v1111_v2 = vsel %vm1058_vm1, %v2937_v59, 0.0  ;;  %2062 = vset.pattern.permute.xlu0 %v2108_v57 }
 0x179   : > { %v2941_v4 = vadd.f32 %v1035_v0, %v862_v62  ;;  %v1037_v5 = vpop.f32.mrb[29].mxu0  ;;  %v1112_v9 = vadd.f32 %v2934_v38, %v1111_v2 }
 0x17a   : > { %v2944_v13 = vadd.f32 %v1037_v5, %v864_v1 }
 0x17b   : > { %1113 = vadd.xlane.f32.xlu1 %v1112_v9  ;;  %v868_v19 = vpop.f32.mrb[30].mxu1 }
 0x17c   : > { %v1041_v10 = vpop.f32.mrb[30].mxu0  ;;  %v870_v11 = vpop.f32.mrb[31].mxu1  ;;  %v1115_v7 = vsel %vm1058_vm1, %v2944_v13, 0.0 }
 0x17d   : > { %v2948_v47 = vadd.f32 %v1041_v10, %v868_v19  ;;  %v1043_v33 = vpop.f32.mrb[31].mxu0  ;;  %v1116_v15 = vadd.f32 %v2941_v4, %v1115_v7 }
 0x17e   : > { %v2951_v55 = vadd.f32 %v1043_v33, %v870_v11 }
 0x17f   : > { %1117 = vadd.xlane.f32.xlu0 %v1116_v15  ;;  %v874_v6 = vpop.f32.mrb[32].mxu1 }
 0x180   : > { %v1047_v20 = vpop.f32.mrb[32].mxu0  ;;  %v876_v21 = vpop.f32.mrb[33].mxu1  ;;  %v1119_v44 = vsel %vm1058_vm1, %v2951_v55, 0.0 }
 0x181   : > { %v2955_v22 = vadd.f32 %v1047_v20, %v874_v6  ;;  %v1049_v60 = vpop.f32.mrb[33].mxu0  ;;  %v1120_v16 = vadd.f32 %v2948_v47, %v1119_v44 }
 0x182   : > { %v2958_v26 = vadd.f32 %v1049_v60, %v876_v21 }
 0x183   : > { %1121 = vadd.xlane.f32.xlu1 %v1120_v16  ;;  %v880_v28 = vpop.f32.mrb[34].mxu1 }
 0x184   : > { %v1053_v29 = vpop.f32.mrb[34].mxu0  ;;  %v882_v17 = vpop.f32.mrb[35].mxu1  ;;  %v1123_v31 = vsel %vm1058_vm1, %v2958_v26, 0.0 }
 0x185   : > { %v2962_v37 = vadd.f32 %v1053_v29, %v880_v28  ;;  %v1055_v39 = vpop.f32.mrb[35].mxu0  ;;  %v1124_v46 = vadd.f32 %v2955_v22, %v1123_v31 }
 0x186   : > { %v2965_v30 = vadd.f32 %v1055_v39, %v882_v17 }
 0x187   : > { %1125 = vadd.xlane.f32.xlu0 %v1124_v46 }
 0x188   : > { %v1127_v49 = vsel %vm1058_vm1, %v2965_v30, 0.0 }
 0x189   : > { %v1128_v52 = vadd.f32 %v2962_v37, %v1127_v49 }
 0x18b   : > { %1129 = vadd.xlane.f32.xlu1 %v1128_v52 }
 0x1d4   : > { %v1062_v43 = vpop.xlane.xlu0 %1061 }
 0x1d5   : > { %v1131_v62 = vmul.f32 0.0051020407, %v1062_v43 }
 0x1d7   : > { %v2971_v0 = vsub.f32 %v2844_v18, %v1131_v62  ;;  %v2974_v1 = vsub.f32 %v2846_v14, %v1131_v62 }
 0x1d8   : > { %v1066_v2 = vpop.xlane.xlu0 %1065 }
 0x1d9   : > { %v1132_v5 = vmul.f32 0.0051020407, %v1066_v2  ;;  %v1185_v9 = vmul.f32 %v2971_v0, %v2971_v0  ;;  %v1186_v19 = vmul.f32 %v2974_v1, %v2974_v1 }
 0x1db   : > { %v2981_v10 = vsub.f32 %v2850_v32, %v1132_v5  ;;  %v2984_v11 = vsub.f32 %v2853_v50, %v1132_v5  ;;  %v1221_v18 = vsel %vm1058_vm1, %v1186_v19, 0.0 }
 0x1dc   : > { %v1070_v7 = vpop.xlane.xlu1 %1069  ;;  %v1222_v33 = vadd.f32 %v1221_v18, %v1185_v9 }
 0x1dd   : > { %v1133_v14 = vmul.f32 0.0051020407, %v1070_v7  ;;  %v1187_v15 = vmul.f32 %v2981_v10, %v2981_v10  ;;  %v1188_v6 = vmul.f32 %v2984_v11, %v2984_v11 }
 0x1de   : > { %1223 = vadd.xlane.f32.xlu0 %v1222_v33 }
 0x1df   : > { %v2992_v20 = vsub.f32 %v2857_v3, %v1133_v14  ;;  %v2995_v32 = vsub.f32 %v2860_v23, %v1133_v14  ;;  %v1225_v50 = vsel %vm1058_vm1, %v1188_v6, 0.0 }
 0x1e0   : > { %v1074_v21 = vpop.xlane.xlu1 %1073  ;;  %v1226_v44 = vadd.f32 %v1225_v50, %v1187_v15 }
 0x1e1   : > { %v1134_v60 = vmul.f32 0.0051020407, %v1074_v21  ;;  %v1189_v16 = vmul.f32 %v2992_v20, %v2992_v20  ;;  %v1190_v28 = vmul.f32 %v2995_v32, %v2995_v32 }
 0x1e2   : > { %1227 = vadd.xlane.f32.xlu1 %v1226_v44 }
 0x1e3   : > { %v3003_v29 = vsub.f32 %v2864_v42, %v1134_v60  ;;  %v3006_v3 = vsub.f32 %v2867_v53, %v1134_v60  ;;  %v1229_v23 = vsel %vm1058_vm1, %v1190_v28, 0.0 }
 0x1e4   : > { %v1078_v17 = vpop.xlane.xlu0 %1077  ;;  %v1230_v31 = vadd.f32 %v1229_v23, %v1189_v16 }
 0x1e5   : > { %v1135_v39 = vmul.f32 0.0051020407, %v1078_v17  ;;  %v1191_v46 = vmul.f32 %v3003_v29, %v3003_v29  ;;  %v1192_v49 = vmul.f32 %v3006_v3, %v3006_v3 }
 0x1e6   : > { %1231 = vadd.xlane.f32.xlu0 %v1230_v31 }
 0x1e7   : > { %v3014_v52 = vsub.f32 %v2871_v34, %v1135_v39  ;;  %v3017_v42 = vsub.f32 %v2874_v25, %v1135_v39  ;;  %v1233_v53 = vsel %vm1058_vm1, %v1192_v49, 0.0 }
 0x1e8   : > { %v1082_v57 = vpop.xlane.xlu1 %1081  ;;  %v1234_v43 = vadd.f32 %v1233_v53, %v1191_v46 }
 0x1e9   : > { %v1136_v62 = vmul.f32 0.0051020407, %v1082_v57  ;;  %v1193_v2 = vmul.f32 %v3014_v52, %v3014_v52  ;;  %v1194_v5 = vmul.f32 %v3017_v42, %v3017_v42 }
 0x1ea   : > { %1235 = vadd.xlane.f32.xlu1 %v1234_v43 }
 0x1eb   : > { %v3025_v9 = vsub.f32 %v2878_v45, %v1136_v62  ;;  %v3028_v34 = vsub.f32 %v2881_v48, %v1136_v62  ;;  %v1237_v25 = vsel %vm1058_vm1, %v1194_v5, 0.0 }
 0x1ec   : > { %v1086_v19 = vpop.xlane.xlu0 %1085  ;;  %v1238_v18 = vadd.f32 %v1237_v25, %v1193_v2 }
 0x1ed   : > { %v1137_v7 = vmul.f32 0.0051020407, %v1086_v19  ;;  %v1195_v33 = vmul.f32 %v3025_v9, %v3025_v9  ;;  %v1196_v14 = vmul.f32 %v3028_v34, %v3028_v34 }
 0x1ee   : > { %1239 = vadd.xlane.f32.xlu0 %v1238_v18 }
 0x1ef   : > { %v3036_v15 = vsub.f32 %v2885_v54, %v1137_v7  ;;  %v3039_v45 = vsub.f32 %v2888_v58, %v1137_v7  ;;  %v1241_v48 = vsel %vm1058_vm1, %v1196_v14, 0.0 }
 0x1f0   : > { %v1090_v6 = vpop.xlane.xlu1 %1089  ;;  %v1242_v50 = vadd.f32 %v1241_v48, %v1195_v33 }
 0x1f1   : > { %v1138_v21 = vmul.f32 0.0051020407, %v1090_v6  ;;  %v1197_v44 = vmul.f32 %v3036_v15, %v3036_v15  ;;  %v1198_v60 = vmul.f32 %v3039_v45, %v3039_v45 }
 0x1f2   : > { %1243 = vadd.xlane.f32.xlu1 %v1242_v50 }
 0x1f3   : > { %v3047_v16 = vsub.f32 %v2892_v51, %v1138_v21  ;;  %v3050_v54 = vsub.f32 %v2895_v56, %v1138_v21  ;;  %v1245_v58 = vsel %vm1058_vm1, %v1198_v60, 0.0 }
 0x1f4   : > { %v1094_v28 = vpop.xlane.xlu0 %1093  ;;  %v1246_v23 = vadd.f32 %v1245_v58, %v1197_v44 }
 0x1f5   : > { %v1139_v17 = vmul.f32 0.0051020407, %v1094_v28  ;;  %v1199_v31 = vmul.f32 %v3047_v16, %v3047_v16  ;;  %v1200_v39 = vmul.f32 %v3050_v54, %v3050_v54 }
 0x1f6   : > { %1247 = vadd.xlane.f32.xlu0 %v1246_v23 }
 0x1f7   : > { %v3058_v46 = vsub.f32 %v2899_v63, %v1139_v17  ;;  %v3061_v51 = vsub.f32 %v2902_v8, %v1139_v17  ;;  %v1249_v56 = vsel %vm1058_vm1, %v1200_v39, 0.0 }
 0x1f8   : > { %v1098_v49 = vpop.xlane.xlu1 %1097  ;;  %v1250_v53 = vadd.f32 %v1249_v56, %v1199_v31 }
 0x1f9   : > { %v1140_v57 = vmul.f32 0.0051020407, %v1098_v49  ;;  %v1201_v43 = vmul.f32 %v3058_v46, %v3058_v46  ;;  %v1202_v62 = vmul.f32 %v3061_v51, %v3061_v51 }
 0x1fa   : > { %1251 = vadd.xlane.f32.xlu1 %v1250_v53 }
 0x1fb   : > { %v3069_v2 = vsub.f32 %v2906_v27, %v1140_v57  ;;  %v3072_v63 = vsub.f32 %v2909_v41, %v1140_v57  ;;  %v1253_v8 = vsel %vm1058_vm1, %v1202_v62, 0.0 }
 0x1fc   : > { %v1102_v5 = vpop.xlane.xlu0 %1101  ;;  %v1254_v25 = vadd.f32 %v1253_v8, %v1201_v43 }
 0x1fd   : > { %v1141_v19 = vmul.f32 0.0051020407, %v1102_v5  ;;  %v1203_v18 = vmul.f32 %v3069_v2, %v3069_v2  ;;  %v1204_v7 = vmul.f32 %v3072_v63, %v3072_v63 }
 0x1fe   : > { %1255 = vadd.xlane.f32.xlu0 %v1254_v25 }
 0x1ff   : > { %v3080_v33 = vsub.f32 %v2913_v61, %v1141_v19  ;;  %v3083_v27 = vsub.f32 %v2916_v24, %v1141_v19  ;;  %v1257_v41 = vsel %vm1058_vm1, %v1204_v7, 0.0 }
 0x200   : > { %v1106_v14 = vpop.xlane.xlu1 %1105  ;;  %v1258_v48 = vadd.f32 %v1257_v41, %v1203_v18 }
 0x201   : > { %v1142_v6 = vmul.f32 0.0051020407, %v1106_v14  ;;  %v1205_v50 = vmul.f32 %v3080_v33, %v3080_v33  ;;  %v1206_v21 = vmul.f32 %v3083_v27, %v3083_v27 }
 0x202   : > { %1259 = vadd.xlane.f32.xlu1 %v1258_v48 }
 0x203   : > { %v3091_v44 = vsub.f32 %v2920_v12, %v1142_v6  ;;  %v3094_v61 = vsub.f32 %v2923_v36, %v1142_v6  ;;  %v1261_v24 = vsel %vm1058_vm1, %v1206_v21, 0.0 }
 0x204   : > { %v1110_v60 = vpop.xlane.xlu0 %1109  ;;  %v1262_v58 = vadd.f32 %v1261_v24, %v1205_v50 }
 0x205   : > { %v1143_v28 = vmul.f32 0.0051020407, %v1110_v60  ;;  %v1207_v23 = vmul.f32 %v3091_v44, %v3091_v44  ;;  %v1208_v17 = vmul.f32 %v3094_v61, %v3094_v61 }
 0x206   : > { %1263 = vadd.xlane.f32.xlu0 %v1262_v58 }
 0x207   : > { %v3102_v31 = vsub.f32 %v2927_v35, %v1143_v28  ;;  %v3105_v12 = vsub.f32 %v2930_v40, %v1143_v28  ;;  %v1265_v36 = vsel %vm1058_vm1, %v1208_v17, 0.0 }
 0x208   : > { %v1114_v39 = vpop.xlane.xlu1 %1113  ;;  %v1266_v56 = vadd.f32 %v1265_v36, %v1207_v23 }
 0x209   : > { %v1144_v49 = vmul.f32 0.0051020407, %v1114_v39  ;;  %v1209_v53 = vmul.f32 %v3102_v31, %v3102_v31  ;;  %v1210_v57 = vmul.f32 %v3105_v12, %v3105_v12 }
 0x20a   : > { %1267 = vadd.xlane.f32.xlu1 %v1266_v56 }
 0x20b   : > { %v3113_v43 = vsub.f32 %v2934_v38, %v1144_v49  ;;  %v3116_v35 = vsub.f32 %v2937_v59, %v1144_v49  ;;  %v1269_v40 = vsel %vm1058_vm1, %v1210_v57, 0.0  ;;  %v1510_v57 = vld [vmem:[%s3163_s27 + $0x8] sm:$0xff] }
 0x20c   : > { %v1118_v62 = vpop.xlane.xlu0 %1117  ;;  %v1270_v8 = vadd.f32 %v1269_v40, %v1209_v53  ;;  %v1513_v53 = vld [vmem:[%s3163_s27 + $0x20] sm:$0xff]  ;;  %v1515_v40 = vld [vmem:[%s3163_s27 + $0x30] sm:$0xff] }
 0x20d   : > { %v1145_v5 = vmul.f32 0.0051020407, %v1118_v62  ;;  %v1211_v25 = vmul.f32 %v3113_v43, %v3113_v43  ;;  %v1212_v19 = vmul.f32 %v3116_v35, %v3116_v35  ;;  %v1512_v62 = vld [vmem:[%s3163_s27 + $0x18] sm:$0xff] }
 0x20e   : > { %1271 = vadd.xlane.f32.xlu0 %v1270_v8  ;;  %v1517_v8 = vld [vmem:[%s3163_s27 + $0x40] sm:$0xff] }
 0x20f   : > { %v3124_v18 = vsub.f32 %v2941_v4, %v1145_v5  ;;  %v3127_v38 = vsub.f32 %v2944_v13, %v1145_v5  ;;  %v1273_v59 = vsel %vm1058_vm1, %v1212_v19, 0.0  ;;  %v1514_v5 = vld [vmem:[%s3163_s27 + $0x28] sm:$0xff]  ;;  %v1516_v19 = vld [vmem:[%s3163_s27 + $0x38] sm:$0xff] }
 0x210   : > { %v1122_v7 = vpop.xlane.xlu1 %1121  ;;  %v1274_v41 = vadd.f32 %v1273_v59, %v1211_v25  ;;  %v1519_v25 = vld [vmem:[%s3163_s27 + $0x50] sm:$0xff]  ;;  %v1518_v59 = vld [vmem:[%s3163_s27 + $0x48] sm:$0xff] }
 0x211   : > { %v1146_v14 = vmul.f32 0.0051020407, %v1122_v7  ;;  %v1213_v48 = vmul.f32 %v3124_v18, %v3124_v18  ;;  %v1214_v6 = vmul.f32 %v3127_v38, %v3127_v38  ;;  %v1520_v7 = vld [vmem:[%s3163_s27 + $0x58] sm:$0xff] }
 0x212   : > { %1275 = vadd.xlane.f32.xlu1 %v1274_v41  ;;  %v1522_v41 = vld [vmem:[%s3163_s27 + $0x68] sm:$0xff] }
 0x213   : > { %v3135_v50 = vsub.f32 %v2948_v47, %v1146_v14  ;;  %v3138_v4 = vsub.f32 %v2951_v55, %v1146_v14  ;;  %v1277_v13 = vsel %vm1058_vm1, %v1214_v6, 0.0  ;;  %v1524_v14 = vld [vmem:[%s3163_s27 + $0x78] sm:$0xff] }
 0x214   : > { %v1126_v21 = vpop.xlane.xlu0 %1125  ;;  %v1278_v24 = vadd.f32 %v1277_v13, %v1213_v48 }
 0x215   : > { %v1147_v60 = vmul.f32 0.0051020407, %v1126_v21  ;;  %v1215_v58 = vmul.f32 %v3135_v50, %v3135_v50  ;;  %v1216_v28 = vmul.f32 %v3138_v4, %v3138_v4 }
 0x216   : > { %1279 = vadd.xlane.f32.xlu0 %v1278_v24 }
 0x217   : > { %v3146_v47 = vsub.f32 %v2955_v22, %v1147_v60  ;;  %v3149_v55 = vsub.f32 %v2958_v26, %v1147_v60  ;;  %v1281_v23 = vsel %vm1058_vm1, %v1216_v28, 0.0  ;;  %v1509_v22 = vld [vmem:[%s3163_s27] sm:$0xff]  ;;  %v1511_v26 = vld [vmem:[%s3163_s27 + $0x10] sm:$0xff] }
 0x218   : > { %v1282_v17 = vadd.f32 %v1281_v23, %v1215_v58  ;;  %v1130_v48 = vpop.xlane.xlu1 %1129 }
 0x219   : > { %v1217_v36 = vmul.f32 %v3146_v47, %v3146_v47  ;;  %v1218_v39 = vmul.f32 %v3149_v55, %v3149_v55  ;;  %v1148_v6 = vmul.f32 0.0051020407, %v1130_v48 }
 0x21a   : > { %1283 = vadd.xlane.f32.xlu1 %v1282_v17 }
 0x21b   : > { %v1285_v56 = vsel %vm1058_vm1, %v1218_v39, 0.0  ;;  %v3180_v13 = vsub.f32 %v2965_v30, %v1148_v6  ;;  %v3183_v21 = vsub.f32 %v2962_v37, %v1148_v6  ;;  %v1521_v37 = vld [vmem:[%s3163_s27 + $0x60] sm:$0xff] }
 0x21c   : > { %v1286_v49 = vadd.f32 %v1285_v56, %v1217_v36 }
 0x21d   : > { %v1220_v24 = vmul.f32 %v3180_v13, %v3180_v13  ;;  %v1219_v60 = vmul.f32 %v3183_v21, %v3183_v21 }
 0x21e   : > { %1287 = vadd.xlane.f32.xlu0 %v1286_v49 }
 0x21f   : > { %v1289_v58 = vsel %vm1058_vm1, %v1220_v24, 0.0 }
 0x220   : > { %v1290_v28 = vadd.f32 %v1289_v58, %v1219_v60  ;;  %v1349_v60 = vld [vmem:[%s3196_s30 + $0x10] sm:$0xff] }
 0x22b   : > { %1529 = vperm.xlu1 %2061, %v1509_v22  }
 0x22f   : > { %1539 = vperm.xlu1 %2061, %v1511_v26   ;;  %v1523_v26 = vld [vmem:[%s3163_s27 + $0x70] sm:$0xff] }
 0x233   : > { %1549 = vperm.xlu1 %2061, %v1513_v53  }
 0x234   : > { %1534 = vperm.xlu0 %2062, %v1510_v57  }
 0x237   : > { %1559 = vperm.xlu1 %2061, %v1515_v40  }
 0x238   : > { %1544 = vperm.xlu0 %2062, %v1512_v62   ;;  %v1347_v62 = vld [vmem:[%s3196_s30] sm:$0xff] }
 0x23b   : > { %1569 = vperm.xlu1 %2061, %v1517_v8  }
 0x23c   : > { %1554 = vperm.xlu0 %2062, %v1514_v5  }
 0x23f   : > { %1579 = vperm.xlu1 %2061, %v1519_v25  }
 0x240   : > { %1564 = vperm.xlu0 %2062, %v1516_v19  }
 0x244   : > { %1574 = vperm.xlu0 %2062, %v1518_v59  }
 0x248   : > { %1584 = vperm.xlu0 %2062, %v1520_v7   ;;  %v1348_v7 = vld [vmem:[%s3196_s30 + $0x8] sm:$0xff] }
 0x24c   : > { %1594 = vperm.xlu0 %2062, %v1522_v41  }
 0x250   : > { %1604 = vperm.xlu0 %2062, %v1524_v14  }
 0x263   : > { %1291 = vadd.xlane.f32.xlu1 %v1290_v28 }
 0x26b   : > { %v1224_v23 = vpop.xlane.xlu0 %1223 }
 0x26c   : > { %v1293_v17 = vmul.f32 0.0051020407, %v1224_v23 }
 0x26e   : > { %v1311_v36 = vadd.f32 1e-05, %v1293_v17 }
 0x26f   : > { %v1228_v30 = vpop.xlane.xlu1 %1227 }
 0x270   : > { %2063 = vrsqrt.f32 %v1311_v36  ;;  %v1294_v39 = vmul.f32 0.0051020407, %v1228_v30  ;;  %v1350_v30 = vld [vmem:[%s3196_s30 + $0x18] sm:$0xff] }
 0x272   : > { %v1312_v56 = vadd.f32 1e-05, %v1294_v39 }
 0x273   : > { %v1232_v49 = vpop.xlane.xlu0 %1231 }
 0x274   : > { %2065 = vrsqrt.f32 %v1312_v56  ;;  %v1295_v22 = vmul.f32 0.0051020407, %v1232_v49  ;;  %1589 = vperm.xlu1 %2061, %v1521_v37  }
 0x276   : > { %v1313_v53 = vadd.f32 1e-05, %v1295_v22 }
 0x277   : > { %v1236_v57 = vpop.xlane.xlu1 %1235 }
 0x278   : > { %2067 = vrsqrt.f32 %v1313_v53  ;;  %v1296_v40 = vmul.f32 0.0051020407, %v1236_v57  ;;  %1599 = vperm.xlu1 %2061, %v1523_v26   ;;  %v1351_v26 = vld [vmem:[%s3196_s30 + $0x20] sm:$0xff] }
 0x27a   : > { %v2064_v8 = vpop.eup %2063  ;;  %v1314_v5 = vadd.f32 1e-05, %v1296_v40 }
 0x27b   : > { %v1240_v25 = vpop.xlane.xlu0 %1239  ;;  %v1365_v19 = vmul.f32 %v2064_v8, %v1347_v62 }
 0x27c   : > { %2069 = vrsqrt.f32 %v1314_v5  ;;  %v1297_v59 = vmul.f32 0.0051020407, %v1240_v25  ;;  %v1352_v5 = vld [vmem:[%s3196_s30 + $0x28] sm:$0xff] }
 0x27d   : > { %1385 = vperm.xlu0 %2062, %v1365_v19  }
 0x27e   : > { %v2066_v41 = vpop.eup %2065  ;;  %v1315_v14 = vadd.f32 1e-05, %v1297_v59 }
 0x27f   : > { %v1244_v48 = vpop.xlane.xlu1 %1243  ;;  %v1366_v6 = vmul.f32 %v2066_v41, %v1348_v7 }
 0x280   : > { %2071 = vrsqrt.f32 %v1315_v14  ;;  %v1298_v24 = vmul.f32 0.0051020407, %v1244_v48  ;;  %v1353_v14 = vld [vmem:[%s3196_s30 + $0x30] sm:$0xff] }
 0x281   : > { %1390 = vperm.xlu1 %2061, %v1366_v6  }
 0x282   : > { %v2068_v58 = vpop.eup %2067  ;;  %v1316_v28 = vadd.f32 1e-05, %v1298_v24 }
 0x283   : > { %v1248_v23 = vpop.xlane.xlu0 %1247  ;;  %v1367_v17 = vmul.f32 %v2068_v58, %v1349_v60 }
 0x284   : > { %2073 = vrsqrt.f32 %v1316_v28  ;;  %v1299_v36 = vmul.f32 0.0051020407, %v1248_v23  ;;  %v1354_v28 = vld [vmem:[%s3196_s30 + $0x38] sm:$0xff] }
 0x285   : > { %1395 = vperm.xlu1 %2061, %v1367_v17  }
 0x286   : > { %v2070_v39 = vpop.eup %2069  ;;  %v1317_v37 = vadd.f32 1e-05, %v1299_v36 }
 0x287   : > { %v1252_v56 = vpop.xlane.xlu1 %1251  ;;  %v1368_v49 = vmul.f32 %v2070_v39, %v1350_v30 }
 0x288   : > { %2075 = vrsqrt.f32 %v1317_v37  ;;  %v1300_v22 = vmul.f32 0.0051020407, %v1252_v56  ;;  %v1355_v37 = vld [vmem:[%s3196_s30 + $0x40] sm:$0xff] }
 0x289   : > { %1400 = vperm.xlu1 %2061, %v1368_v49  }
 0x28a   : > { %v2072_v53 = vpop.eup %2071  ;;  %v1318_v57 = vadd.f32 1e-05, %v1300_v22 }
 0x28b   : > { %v1256_v40 = vpop.xlane.xlu0 %1255  ;;  %v1369_v62 = vmul.f32 %v2072_v53, %v1351_v26 }
 0x28c   : > { %2077 = vrsqrt.f32 %v1318_v57  ;;  %v1301_v8 = vmul.f32 0.0051020407, %v1256_v40  ;;  %v1356_v57 = vld [vmem:[%s3196_s30 + $0x48] sm:$0xff] }
 0x28d   : > { %1405 = vperm.xlu1 %2061, %v1369_v62  }
 0x28e   : > { %v2074_v25 = vpop.eup %2073  ;;  %v1319_v19 = vadd.f32 1e-05, %v1301_v8 }
 0x28f   : > { %v1260_v59 = vpop.xlane.xlu1 %1259  ;;  %v1370_v7 = vmul.f32 %v2074_v25, %v1352_v5 }
 0x290   : > { %2079 = vrsqrt.f32 %v1319_v19  ;;  %v1302_v41 = vmul.f32 0.0051020407, %v1260_v59  ;;  %v1357_v19 = vld [vmem:[%s3196_s30 + $0x50] sm:$0xff] }
 0x291   : > { %1410 = vperm.xlu1 %2061, %v1370_v7  }
 0x292   : > { %v2076_v48 = vpop.eup %2075  ;;  %v1320_v6 = vadd.f32 1e-05, %v1302_v41 }
 0x293   : > { %v1264_v24 = vpop.xlane.xlu0 %1263  ;;  %v1371_v60 = vmul.f32 %v2076_v48, %v1353_v14 }
 0x294   : > { %2081 = vrsqrt.f32 %v1320_v6  ;;  %v1303_v58 = vmul.f32 0.0051020407, %v1264_v24  ;;  %v1358_v6 = vld [vmem:[%s3196_s30 + $0x58] sm:$0xff] }
 0x295   : > { %1415 = vperm.xlu1 %2061, %v1371_v60  }
 0x296   : > { %v2078_v23 = vpop.eup %2077  ;;  %v1321_v17 = vadd.f32 1e-05, %v1303_v58 }
 0x297   : > { %v1268_v36 = vpop.xlane.xlu1 %1267  ;;  %v1372_v30 = vmul.f32 %v2078_v23, %v1354_v28 }
 0x298   : > { %2083 = vrsqrt.f32 %v1321_v17  ;;  %v1304_v39 = vmul.f32 0.0051020407, %v1268_v36  ;;  %v1359_v17 = vld [vmem:[%s3196_s30 + $0x60] sm:$0xff] }
 0x299   : > { %1420 = vperm.xlu1 %2061, %v1372_v30  }
 0x29a   : > { %v2080_v56 = vpop.eup %2079  ;;  %v1322_v49 = vadd.f32 1e-05, %v1304_v39 }
 0x29b   : > { %v1272_v22 = vpop.xlane.xlu0 %1271  ;;  %v1373_v26 = vmul.f32 %v2080_v56, %v1355_v37 }
 0x29c   : > { %2085 = vrsqrt.f32 %v1322_v49  ;;  %v1305_v53 = vmul.f32 0.0051020407, %v1272_v22  ;;  %v1360_v49 = vld [vmem:[%s3196_s30 + $0x68] sm:$0xff] }
 0x29d   : > { %1425 = vperm.xlu1 %2061, %v1373_v26  }
 0x29e   : > { %v2082_v40 = vpop.eup %2081  ;;  %v1323_v62 = vadd.f32 1e-05, %v1305_v53 }
 0x29f   : > { %v1276_v8 = vpop.xlane.xlu1 %1275  ;;  %v1374_v5 = vmul.f32 %v2082_v40, %v1356_v57  ;;  %v1361_v57 = vld [vmem:[%s3196_s30 + $0x70] sm:$0xff] }
 0x2a0   : > { %2087 = vrsqrt.f32 %v1323_v62  ;;  %v1306_v25 = vmul.f32 0.0051020407, %v1276_v8  ;;  %v1362_v8 = vld [vmem:[%s3196_s30 + $0x78] sm:$0xff] }
 0x2a1   : > { %1430 = vperm.xlu0 %2062, %v1374_v5  }
 0x2a2   : > { %v2084_v59 = vpop.eup %2083  ;;  %v1324_v7 = vadd.f32 1e-05, %v1306_v25 }
 0x2a3   : > { %v1280_v41 = vpop.xlane.xlu0 %1279  ;;  %v1375_v14 = vmul.f32 %v2084_v59, %v1357_v19  ;;  %v1363_v19 = vld [vmem:[%s3196_s30 + $0x80] sm:$0xff] }
 0x2a4   : > { %2089 = vrsqrt.f32 %v1324_v7  ;;  %v1307_v48 = vmul.f32 0.0051020407, %v1280_v41  ;;  %v1525_v41 = vld [vmem:[%s3163_s27 + $0x80] sm:$0xff] }
 0x2a5   : > { %1435 = vperm.xlu1 %2061, %v1375_v14  }
 0x2a6   : > { %v2086_v24 = vpop.eup %2085  ;;  %v1325_v60 = vadd.f32 1e-05, %v1307_v48 }
 0x2a7   : > { %v1284_v58 = vpop.xlane.xlu1 %1283  ;;  %v1376_v28 = vmul.f32 %v2086_v24, %v1358_v6 }
 0x2a8   : > { %2091 = vrsqrt.f32 %v1325_v60  ;;  %v1308_v23 = vmul.f32 0.0051020407, %v1284_v58 }
 0x2a9   : > { %1440 = vperm.xlu0 %2062, %v1376_v28  }
 0x2aa   : > { %v2088_v36 = vpop.eup %2087  ;;  %v1326_v30 = vadd.f32 1e-05, %v1308_v23 }
 0x2ab   : > { %v1288_v39 = vpop.xlane.xlu0 %1287  ;;  %v1377_v37 = vmul.f32 %v2088_v36, %v1359_v17  ;;  %v1530_v48 = vpop.permute.xlu1 %1529 }
 0x2ac   : > { %2093 = vrsqrt.f32 %v1326_v30  ;;  %v1309_v56 = vmul.f32 0.0051020407, %v1288_v39 }
 0x2ad   : > { %1445 = vperm.xlu1 %2061, %v1377_v37  }
 0x2ae   : > { %v2090_v22 = vpop.eup %2089  ;;  %v1327_v26 = vadd.f32 1e-05, %v1309_v56 }
 0x2af   : > { %v1378_v53 = vmul.f32 %v2090_v22, %v1360_v49  ;;  %v1540_v24 = vpop.permute.xlu1 %1539 }
 0x2b0   : > { %2095 = vrsqrt.f32 %v1327_v26 }
 0x2b1   : > { %1450 = vperm.xlu0 %2062, %v1378_v53  }
 0x2b2   : > { %v2092_v40 = vpop.eup %2091 }
 0x2b3   : > { %v1379_v62 = vmul.f32 %v2092_v40, %v1361_v57  ;;  %v1535_v14 = vpop.permute.xlu0 %1534  ;;  %v1550_v58 = vpop.permute.xlu1 %1549 }
 0x2b5   : > { %1455 = vperm.xlu1 %2061, %v1379_v62  }
 0x2b6   : > { %v2094_v5 = vpop.eup %2093 }
 0x2b7   : > { %v1380_v25 = vmul.f32 %v2094_v5, %v1362_v8  ;;  %v1545_v6 = vpop.permute.xlu0 %1544  ;;  %v3221_v23 = vpop.permute.xlu1 %1559  ;;  %v1364_v5 = vld [vmem:[%s3196_s30 + $0x88] sm:$0xff] }
 0x2b9   : > { %1460 = vperm.xlu0 %2062, %v1380_v25  }
 0x2ba   : > { %v2096_v59 = vpop.eup %2095 }
 0x2bb   : > { %v1381_v7 = vmul.f32 %v2096_v59, %v1363_v19  ;;  %v3217_v60 = vpop.permute.xlu0 %1554  ;;  %v3225_v36 = vpop.permute.xlu1 %1569 }
 0x2bd   : > { %1465 = vperm.xlu1 %2061, %v1381_v7  }
 0x2bf   : > { %v3219_v28 = vpop.permute.xlu0 %1564  ;;  %v3229_v39 = vpop.permute.xlu1 %1579 }
 0x2c1   : > { %1609 = vperm.xlu1 %2061, %v1525_v41  }
 0x2c3   : > { %v3223_v17 = vpop.permute.xlu0 %1574 }
 0x2c7   : > { %v3227_v30 = vpop.permute.xlu0 %1584 }
 0x2cb   : > { %v3231_v56 = vpop.permute.xlu0 %1594 }
 0x2cf   : > { %v3235_v53 = vpop.permute.xlu0 %1604 }
 0x2f0   : > { %v1292_v37 = vpop.xlane.xlu1 %1291 }
 0x2f1   : > { %v1310_v49 = vmul.f32 0.0051020407, %v1292_v37 }
 0x2f3   : > { %v1328_v22 = vadd.f32 1e-05, %v1310_v49 }
 0x2f4   : > { %v3233_v26 = vpop.permute.xlu1 %1589 }
 0x2f5   : > { %2097 = vrsqrt.f32 %v1328_v22  ;;  %v1526_v22 = vld [vmem:[%s3163_s27 + $0x88] sm:$0xff] }
 0x2f8   : > { %v3238_v57 = vpop.permute.xlu1 %1599 }
 0x2fc   : > { %v1386_v40 = vpop.permute.xlu0 %1385 }
 0x2fd   : > { %v1473_v62 = vmul.f32 %v1386_v40, %v2971_v0  ;;  %v1474_v8 = vmul.f32 %v1386_v40, %v2974_v1 }
 0x2ff   : > { %v2098_v25 = vpop.eup %2097  ;;  %v1617_v19 = vadd.f32 %v1530_v48, %v1473_v62  ;;  %v1618_v59 = vadd.f32 %v1530_v48, %v1474_v8 }
 0x300   : > { %v1391_v7 = vpop.permute.xlu1 %1390  ;;  %v1382_v41 = vmul.f32 %v2098_v25, %v1364_v5 }
 0x301   : > { %1653 = vst [vmem:[%s3246_s8] sm:$0xff] %v1617_v19  ;;  %1654 = vst.msk [vmem:[%s3246_s8 + $0x8] sm:$0xff] %vm1058_vm1, %v1618_v59  ;;  %v1475_v0 = vmul.f32 %v1391_v7, %v2981_v10  ;;  %v1476_v1 = vmul.f32 %v1391_v7, %v2984_v11 }
 0x302   : > { %1470 = vperm.xlu0 %2062, %v1382_v41  }
 0x303   : > { %v1619_v37 = vadd.f32 %v1535_v14, %v1475_v0  ;;  %v1620_v49 = vadd.f32 %v1535_v14, %v1476_v1 }
 0x304   : > { %v1396_v40 = vpop.permute.xlu1 %1395 }
 0x305   : > { %1655 = vst [vmem:[%s3246_s8 + $0x10] sm:$0xff] %v1619_v37  ;;  %1656 = vst.msk [vmem:[%s3246_s8 + $0x18] sm:$0xff] %vm1058_vm1, %v1620_v49  ;;  %v1477_v48 = vmul.f32 %v1396_v40, %v2992_v20  ;;  %v1478_v62 = vmul.f32 %v1396_v40, %v2995_v32 }
 0x306   : > { %1614 = vperm.xlu0 %2062, %v1526_v22  }
 0x307   : > { %v1621_v8 = vadd.f32 %v1540_v24, %v1477_v48  ;;  %v1622_v10 = vadd.f32 %v1540_v24, %v1478_v62 }
 0x308   : > { %v1401_v5 = vpop.permute.xlu1 %1400 }
 0x309   : > { %1657 = vst [vmem:[%s3246_s8 + $0x20] sm:$0xff] %v1621_v8  ;;  %1658 = vst.msk [vmem:[%s3246_s8 + $0x28] sm:$0xff] %vm1058_vm1, %v1622_v10  ;;  %v1479_v11 = vmul.f32 %v1401_v5, %v3003_v29  ;;  %v1480_v14 = vmul.f32 %v1401_v5, %v3006_v3 }
 0x30b   : > { %v1623_v25 = vadd.f32 %v1545_v6, %v1479_v11  ;;  %v1624_v19 = vadd.f32 %v1545_v6, %v1480_v14 }
 0x30c   : > { %v1406_v59 = vpop.permute.xlu1 %1405 }
 0x30d   : > { %1659 = vst [vmem:[%s3246_s8 + $0x30] sm:$0xff] %v1623_v25  ;;  %1660 = vst.msk [vmem:[%s3246_s8 + $0x38] sm:$0xff] %vm1058_vm1, %v1624_v19  ;;  %v1481_v20 = vmul.f32 %v1406_v59, %v3014_v52  ;;  %v1482_v32 = vmul.f32 %v1406_v59, %v3017_v42 }
 0x30f   : > { %v1625_v24 = vadd.f32 %v1550_v58, %v1481_v20  ;;  %v1626_v7 = vadd.f32 %v1550_v58, %v1482_v32 }
 0x310   : > { %v1411_v41 = vpop.permute.xlu1 %1410 }
 0x311   : > { %1661 = vst [vmem:[%s3246_s8 + $0x40] sm:$0xff] %v1625_v24  ;;  %1662 = vst.msk [vmem:[%s3246_s8 + $0x48] sm:$0xff] %vm1058_vm1, %v1626_v7  ;;  %v1483_v29 = vmul.f32 %v1411_v41, %v3025_v9  ;;  %v1484_v3 = vmul.f32 %v1411_v41, %v3028_v34 }
 0x313   : > { %v1627_v6 = vadd.f32 %v3217_v60, %v1483_v29  ;;  %v1628_v0 = vadd.f32 %v3217_v60, %v1484_v3 }
 0x314   : > { %v1416_v52 = vpop.permute.xlu1 %1415 }
 0x315   : > { %1663 = vst [vmem:[%s3246_s8 + $0x50] sm:$0xff] %v1627_v6  ;;  %1664 = vst.msk [vmem:[%s3246_s8 + $0x58] sm:$0xff] %vm1058_vm1, %v1628_v0  ;;  %v1485_v42 = vmul.f32 %v1416_v52, %v3036_v15  ;;  %v1486_v58 = vmul.f32 %v1416_v52, %v3039_v45 }
 0x317   : > { %v1629_v1 = vadd.f32 %v3221_v23, %v1485_v42  ;;  %v1630_v9 = vadd.f32 %v3221_v23, %v1486_v58 }
 0x318   : > { %v1421_v34 = vpop.permute.xlu1 %1420 }
 0x319   : > { %1665 = vst [vmem:[%s3246_s8 + $0x60] sm:$0xff] %v1629_v1  ;;  %1666 = vst.msk [vmem:[%s3246_s8 + $0x68] sm:$0xff] %vm1058_vm1, %v1630_v9  ;;  %v1487_v60 = vmul.f32 %v1421_v34, %v3047_v16  ;;  %v1488_v37 = vmul.f32 %v1421_v34, %v3050_v54 }
 0x31b   : > { %v1631_v49 = vadd.f32 %v3219_v28, %v1487_v60  ;;  %v1632_v15 = vadd.f32 %v3219_v28, %v1488_v37 }
 0x31c   : > { %v1426_v45 = vpop.permute.xlu1 %1425 }
 0x31d   : > { %1667 = vst [vmem:[%s3246_s8 + $0x70] sm:$0xff] %v1631_v49  ;;  %1668 = vst.msk [vmem:[%s3246_s8 + $0x78] sm:$0xff] %vm1058_vm1, %v1632_v15  ;;  %v1489_v23 = vmul.f32 %v1426_v45, %v3058_v46  ;;  %v1490_v22 = vmul.f32 %v1426_v45, %v3061_v51 }
 0x31f   : > { %v1633_v40 = vadd.f32 %v3225_v36, %v1489_v23  ;;  %v1634_v16 = vadd.f32 %v3225_v36, %v1490_v22 }
 0x320   : > { %v1431_v54 = vpop.permute.xlu0 %1430 }
 0x321   : > { %1669 = vst [vmem:[%s3246_s8 + $0x80] sm:$0xff] %v1633_v40  ;;  %1670 = vst.msk [vmem:[%s3246_s8 + $0x88] sm:$0xff] %vm1058_vm1, %v1634_v16  ;;  %v1491_v28 = vmul.f32 %v1431_v54, %v3069_v2  ;;  %v1492_v48 = vmul.f32 %v1431_v54, %v3072_v63 }
 0x323   : > { %v1635_v62 = vadd.f32 %v3223_v17, %v1491_v28  ;;  %v1636_v46 = vadd.f32 %v3223_v17, %v1492_v48 }
 0x324   : > { %v1436_v51 = vpop.permute.xlu1 %1435 }
 0x325   : > { %1671 = vst [vmem:[%s3246_s8 + $0x90] sm:$0xff] %v1635_v62  ;;  %1672 = vst.msk [vmem:[%s3246_s8 + $0x98] sm:$0xff] %vm1058_vm1, %v1636_v46  ;;  %v1493_v36 = vmul.f32 %v1436_v51, %v3080_v33  ;;  %v1494_v8 = vmul.f32 %v1436_v51, %v3083_v27 }
 0x327   : > { %v1637_v10 = vadd.f32 %v3229_v39, %v1493_v36  ;;  %v1638_v2 = vadd.f32 %v3229_v39, %v1494_v8 }
 0x328   : > { %v1441_v63 = vpop.permute.xlu0 %1440 }
 0x329   : > { %1673 = vst [vmem:[%s3246_s8 + $0xa0] sm:$0xff] %v1637_v10  ;;  %1674 = vst.msk [vmem:[%s3246_s8 + $0xa8] sm:$0xff] %vm1058_vm1, %v1638_v2  ;;  %v1495_v17 = vmul.f32 %v1441_v63, %v3091_v44  ;;  %v1496_v5 = vmul.f32 %v1441_v63, %v3094_v61 }
 0x32b   : > { %v1639_v11 = vadd.f32 %v3227_v30, %v1495_v17  ;;  %v1640_v33 = vadd.f32 %v3227_v30, %v1496_v5 }
 0x32c   : > { %v1446_v27 = vpop.permute.xlu1 %1445 }
 0x32d   : > { %1675 = vst [vmem:[%s3246_s8 + $0xb0] sm:$0xff] %v1639_v11  ;;  %1676 = vst.msk [vmem:[%s3246_s8 + $0xb8] sm:$0xff] %vm1058_vm1, %v1640_v33  ;;  %v1497_v39 = vmul.f32 %v1446_v27, %v3102_v31  ;;  %v1498_v14 = vmul.f32 %v1446_v27, %v3105_v12 }
 0x32f   : > { %v1641_v25 = vadd.f32 %v3233_v26, %v1497_v39  ;;  %v1642_v44 = vadd.f32 %v3233_v26, %v1498_v14 }
 0x330   : > { %v1451_v61 = vpop.permute.xlu0 %1450 }
 0x331   : > { %1677 = vst [vmem:[%s3246_s8 + $0xc0] sm:$0xff] %v1641_v25  ;;  %1678 = vst.msk [vmem:[%s3246_s8 + $0xc8] sm:$0xff] %vm1058_vm1, %v1642_v44  ;;  %v1499_v30 = vmul.f32 %v1451_v61, %v3113_v43  ;;  %v1500_v19 = vmul.f32 %v1451_v61, %v3116_v35 }
 0x333   : > { %v1643_v59 = vadd.f32 %v3231_v56, %v1499_v30  ;;  %v1644_v31 = vadd.f32 %v3231_v56, %v1500_v19 }
 0x334   : > { %v1456_v12 = vpop.permute.xlu1 %1455 }
 0x335   : > { %1679 = vst [vmem:[%s3246_s8 + $0xd0] sm:$0xff] %v1643_v59  ;;  %1680 = vst.msk [vmem:[%s3246_s8 + $0xd8] sm:$0xff] %vm1058_vm1, %v1644_v31  ;;  %v1501_v26 = vmul.f32 %v1456_v12, %v3124_v18  ;;  %v1502_v20 = vmul.f32 %v1456_v12, %v3127_v38 }
 0x337   : > { %v1645_v32 = vadd.f32 %v3238_v57, %v1501_v26  ;;  %v1646_v43 = vadd.f32 %v3238_v57, %v1502_v20 }
 0x338   : > { %v1461_v35 = vpop.permute.xlu0 %1460 }
 0x339   : > { %1681 = vst [vmem:[%s3246_s8 + $0xe0] sm:$0xff] %v1645_v32  ;;  %1682 = vst.msk [vmem:[%s3246_s8 + $0xe8] sm:$0xff] %vm1058_vm1, %v1646_v43  ;;  %v1503_v56 = vmul.f32 %v1461_v35, %v3135_v50  ;;  %v1504_v24 = vmul.f32 %v1461_v35, %v3138_v4 }
 0x33b   : > { %v1647_v7 = vadd.f32 %v3235_v53, %v1503_v56  ;;  %v1648_v18 = vadd.f32 %v3235_v53, %v1504_v24 }
 0x33c   : > { %v1466_v41 = vpop.permute.xlu1 %1465 }
 0x33d   : > { %1683 = vst [vmem:[%s3246_s8 + $0xf0] sm:$0xff] %v1647_v7  ;;  %1684 = vst.msk [vmem:[%s3246_s8 + $0xf8] sm:$0xff] %vm1058_vm1, %v1648_v18  ;;  %v1505_v38 = vmul.f32 %v1466_v41, %v3146_v47  ;;  %v1506_v57 = vmul.f32 %v1466_v41, %v3149_v55 }
 0x340   : > { %v1610_v29 = vpop.permute.xlu1 %1609 }
 0x341   : > { %v1649_v3 = vadd.f32 %v1610_v29, %v1505_v38  ;;  %v1650_v6 = vadd.f32 %v1610_v29, %v1506_v57 }
 0x343   : > { %1685 = vst [vmem:[%s3246_s8 + $0x100] sm:$0xff] %v1649_v3  ;;  %1686 = vst.msk [vmem:[%s3246_s8 + $0x108] sm:$0xff] %vm1058_vm1, %v1650_v6 }
 0x381   : > { %v1471_v50 = vpop.permute.xlu0 %1470 }
 0x382   : > { %v1507_v4 = vmul.f32 %v1471_v50, %v3183_v21  ;;  %v1508_v53 = vmul.f32 %v1471_v50, %v3180_v13 }
 0x385   : > { %v1615_v0 = vpop.permute.xlu0 %1614 }
 0x386   : > { %v1651_v52 = vadd.f32 %v1615_v0, %v1507_v4  ;;  %v1652_v42 = vadd.f32 %v1615_v0, %v1508_v53 }
 0x388   : > { %1687 = vst [vmem:[%s3246_s8 + $0x110] sm:$0xff] %v1651_v52  ;;  %1688 = vst.msk [vmem:[%s3246_s8 + $0x118] sm:$0xff] %vm1058_vm1, %v1652_v42 }
 0x389 PF: > { %s14_s15 = sadd.s32 1, %s2105_s15  }
 0x38a   : > { %p11_p4 = scmp.ge.s32.totalorder %s14_s15, 6  }
 0x38c   :  { %13 = sbr.rel (!%p11_p4) target bundleno = 1 (0x1), region = 72 }

</bundles_post_ra>
